<compile_context>
chip_gen: v5e
topology: v5e:2x2
jax: 0.10.0
libtpu: 0.0.40
codegen_flags: <defaults>
</compile_context>

<pallas_src>
import jax
import jax.numpy as jnp
from jax import lax
from jax.experimental import pallas as pl
from jax.experimental.pallas import tpu as pltpu

ACTION_DIM = 2
ENVIRONMENT_DIM = 20
ROBOT_DIM = 4
STATE_DIM = ENVIRONMENT_DIM + ROBOT_DIM  # 24
H1 = 800
H2 = 600

# Packed-bias layout: each bias starts on a 128-lane boundary so the in-kernel
# static slices are lane-aligned (no cross-lane rotate).
_B1_OFF = 0
_B2_OFF = ((H1 + 127) // 128) * 128            # 896
_B3_OFF = _B2_OFF + ((H2 + 127) // 128) * 128  # 1536
_BIAS_LEN = _B3_OFF + 128                      # 1664


def _actor_kernel(s_ref, w1_ref, w2_ref, w3_ref, bias_ref, a_ref):
    b1 = bias_ref[:, _B1_OFF:_B1_OFF + H1]                      # [1, 800] f32
    b2 = bias_ref[:, _B2_OFF:_B2_OFF + H2]                      # [1, 600] f32
    b3 = bias_ref[:, _B3_OFF:_B3_OFF + ACTION_DIM]              # [1, 2]   f32

    # bf16 operands straight into the MXU, f32 accumulation. No f32 weight
    # copies are materialized in VMEM.
    x = s_ref[...].astype(jnp.bfloat16)                         # [B, 24]
    h = jnp.dot(x, w1_ref[...], preferred_element_type=jnp.float32) + b1
    h = jnp.maximum(h, 0.0).astype(jnp.bfloat16)                # [B, 800]

    h = jnp.dot(h, w2_ref[...], preferred_element_type=jnp.float32) + b2
    h = jnp.maximum(h, 0.0).astype(jnp.bfloat16)                # [B, 600]

    # W3 is stored lane-dense as [ACTION_DIM, H2] = [2, 600]; contract the
    # last dims of both operands (h @ W3^T).
    out = lax.dot_general(
        h, w3_ref[...],
        dimension_numbers=(((1,), (1,)), ((), ())),
        preferred_element_type=jnp.float32,
    ) + b3                                                      # [B, 2]
    a_ref[...] = jnp.tanh(out).astype(a_ref.dtype)


def actor_forward(s, params):
    """params: dict with
         w1: [24, 800] bf16 (pre-transposed, in-major)
         w2: [800, 600] bf16 (pre-transposed, in-major)
         w3: [2, 600]  bf16 (out-major, lane-dense)
         bias: [1, 1664] f32 packed bias row.
    Works for any batch size B; larger B amortizes the fixed weight DMA."""
    B = s.shape[0]
    args = (s, params["w1"], params["w2"], params["w3"], params["bias"])

    flops = 2 * B * (STATE_DIM * H1 + H1 * H2 + H2 * ACTION_DIM)
    bytes_accessed = (
        sum(int(x.size) * x.dtype.itemsize for x in args)
        + B * ACTION_DIM * 4
    )

    vmem_spec = pl.BlockSpec(memory_space=pltpu.MemorySpace.VMEM)
    return pl.pallas_call(
        _actor_kernel,
        in_specs=[vmem_spec] * len(args),
        out_specs=vmem_spec,
        out_shape=jax.ShapeDtypeStruct((B, ACTION_DIM), jnp.float32),
        compiler_params=pltpu.CompilerParams(vmem_limit_bytes=8 << 20),
        cost_estimate=pl.CostEstimate(
            flops=flops,
            transcendentals=B * ACTION_DIM,
            bytes_accessed=bytes_accessed,
        ),
    )(*args)


def _init_linear(key, fan_in, fan_out):
    # PyTorch nn.Linear default init: U(-1/sqrt(fan_in), 1/sqrt(fan_in)).
    kw, kb = jax.random.split(key)
    bound = 1.0 / jnp.sqrt(jnp.float32(fan_in))
    # Stored transposed [in, out] (matmul-ready for layers 1 and 2).
    w = jax.random.uniform(kw, (fan_in, fan_out), jnp.float32, -bound, bound)
    b = jax.random.uniform(kb, (fan_out,), jnp.float32, -bound, bound)
    return w, b


def init_actor_params(key):
    k1, k2, k3 = jax.random.split(key, 3)
    w1, b1 = _init_linear(k1, STATE_DIM, H1)         # [24, 800]
    w2, b2 = _init_linear(k2, H1, H2)                # [800, 600]
    w3, b3 = _init_linear(k3, H2, ACTION_DIM)        # [600, 2]

    bias = jnp.zeros((1, _BIAS_LEN), jnp.float32)
    bias = bias.at[0, _B1_OFF:_B1_OFF + H1].set(b1)
    bias = bias.at[0, _B2_OFF:_B2_OFF + H2].set(b2)
    bias = bias.at[0, _B3_OFF:_B3_OFF + ACTION_DIM].set(b3)

    return dict(
        w1=w1.astype(jnp.bfloat16),
        w2=w2.astype(jnp.bfloat16),
        # W3 kept out-major [2, 600] so its HBM/VMEM tiled footprint is ~20 KB
        # instead of ~156 KB for [600, 2].
        w3=w3.T.astype(jnp.bfloat16),
        bias=bias,
    )


def actor_reference(s, p):
    """Pure-JAX reference mirroring the kernel numerics (bf16 weights, bf16
    matmul inputs, f32 accumulation) and the PyTorch forward structure."""
    b1 = p["bias"][:, _B1_OFF:_B1_OFF + H1]
    b2 = p["bias"][:, _B2_OFF:_B2_OFF + H2]
    b3 = p["bias"][:, _B3_OFF:_B3_OFF + ACTION_DIM]

    h = s.astype(jnp.bfloat16)
    h = lax.dot_general(h, p["w1"], (((1,), (0,)), ((), ())),
                        preferred_element_type=jnp.float32) + b1
    h = jax.nn.relu(h).astype(jnp.bfloat16)
    h = lax.dot_general(h, p["w2"], (((1,), (0,)), ((), ())),
                        preferred_element_type=jnp.float32) + b2
    h = jax.nn.relu(h).astype(jnp.bfloat16)
    out = lax.dot_general(h, p["w3"], (((1,), (1,)), ((), ())),
                          preferred_element_type=jnp.float32) + b3
    return jnp.tanh(out)


if __name__ == "__main__":
    key = jax.random.PRNGKey(0)
    k_params, k_s = jax.random.split(key, 2)

    B = 8  # sublane-aligned demo batch; any B works and larger B is cheaper/state
    params = init_actor_params(k_params)
    s = jax.random.normal(k_s, (B, STATE_DIM), jnp.float32)

    a = actor_forward(s, params)
    a = jax.block_until_ready(a)

    a_ref = actor_reference(s, params)
    assert a.shape == (B, ACTION_DIM)
    assert bool(jnp.all(jnp.abs(a) <= 1.0 + 1e-6))
    assert jnp.allclose(a, a_ref, atol=2e-3, rtol=2e-3)

    print("KERNEL_OK")
</pallas_src>

<mosaic_0001>
module attributes {stable_mosaic.version = 11 : i64} {
  func.func @_actor_kernel(%arg0: memref<8x24xf32, #tpu.memory_space<vmem>>, %arg1: memref<24x800xbf16, #tpu.memory_space<vmem>>, %arg2: memref<800x600xbf16, #tpu.memory_space<vmem>>, %arg3: memref<2x600xbf16, #tpu.memory_space<vmem>>, %arg4: memref<1x1664xf32, #tpu.memory_space<vmem>>, %arg5: memref<8x2xf32, #tpu.memory_space<vmem>>) attributes {dimension_semantics = [], scalar_prefetch = 0 : i64, scratch_operands = 0 : i64, tpu.core_type = #tpu.core_type<tc>} {
    %c0 = arith.constant 0 : index
    %c0_0 = arith.constant 0 : index
    %0 = vector.load %arg4[%c0, %c0_0] : memref<1x1664xf32, #tpu.memory_space<vmem>>, vector<1x800xf32>
    %c0_1 = arith.constant 0 : index
    %c896 = arith.constant 896 : index
    %1 = vector.load %arg4[%c0_1, %c896] : memref<1x1664xf32, #tpu.memory_space<vmem>>, vector<1x600xf32>
    %c0_2 = arith.constant 0 : index
    %c1536 = arith.constant 1536 : index
    %2 = vector.load %arg4[%c0_2, %c1536] : memref<1x1664xf32, #tpu.memory_space<vmem>>, vector<1x2xf32>
    %c0_3 = arith.constant 0 : index
    %c0_4 = arith.constant 0 : index
    %3 = vector.load %arg0[%c0_3, %c0_4] : memref<8x24xf32, #tpu.memory_space<vmem>>, vector<8x24xf32>
    %4 = arith.truncf %3 : vector<8x24xf32> to vector<8x24xbf16>
    %c0_5 = arith.constant 0 : index
    %c0_6 = arith.constant 0 : index
    %5 = vector.load %arg1[%c0_5, %c0_6] : memref<24x800xbf16, #tpu.memory_space<vmem>>, vector<24x800xbf16>
    %cst = arith.constant dense<0.000000e+00> : vector<8x800xf32>
    %6 = tpu.matmul %4, %5, %cst {dimension_numbers = #tpu.dot_dimension_numbers<[1], [0], [0], [1], [0, 0, 1, 1], [], []>} : vector<8x24xbf16>, vector<24x800xbf16>, vector<8x800xf32> -> vector<8x800xf32>
    %7 = vector.broadcast %0 : vector<1x800xf32> to vector<8x800xf32>
    %8 = arith.addf %6, %7 : vector<8x800xf32>
    %cst_7 = arith.constant 0.000000e+00 : f32
    %9 = vector.broadcast %cst_7 : f32 to vector<8x800xf32>
    %10 = arith.maximumf %8, %9 : vector<8x800xf32>
    %11 = arith.truncf %10 : vector<8x800xf32> to vector<8x800xbf16>
    %c0_8 = arith.constant 0 : index
    %c0_9 = arith.constant 0 : index
    %12 = vector.load %arg2[%c0_8, %c0_9] : memref<800x600xbf16, #tpu.memory_space<vmem>>, vector<800x600xbf16>
    %cst_10 = arith.constant dense<0.000000e+00> : vector<8x600xf32>
    %13 = tpu.matmul %11, %12, %cst_10 {dimension_numbers = #tpu.dot_dimension_numbers<[1], [0], [0], [1], [0, 0, 1, 1], [], []>} : vector<8x800xbf16>, vector<800x600xbf16>, vector<8x600xf32> -> vector<8x600xf32>
    %14 = vector.broadcast %1 : vector<1x600xf32> to vector<8x600xf32>
    %15 = arith.addf %13, %14 : vector<8x600xf32>
    %cst_11 = arith.constant 0.000000e+00 : f32
    %16 = vector.broadcast %cst_11 : f32 to vector<8x600xf32>
    %17 = arith.maximumf %15, %16 : vector<8x600xf32>
    %18 = arith.truncf %17 : vector<8x600xf32> to vector<8x600xbf16>
    %c0_12 = arith.constant 0 : index
    %c0_13 = arith.constant 0 : index
    %19 = vector.load %arg3[%c0_12, %c0_13] : memref<2x600xbf16, #tpu.memory_space<vmem>>, vector<2x600xbf16>
    %cst_14 = arith.constant dense<0.000000e+00> : vector<8x2xf32>
    %20 = tpu.matmul %18, %19, %cst_14 {dimension_numbers = #tpu.dot_dimension_numbers<[1], [1], [0], [0], [0, 0, 1, 0], [], []>} : vector<8x600xbf16>, vector<2x600xbf16>, vector<8x2xf32> -> vector<8x2xf32>
    %21 = vector.broadcast %2 : vector<1x2xf32> to vector<8x2xf32>
    %22 = arith.addf %20, %21 : vector<8x2xf32>
    %23 = math.tanh %22 : vector<8x2xf32>
    %c0_15 = arith.constant 0 : index
    %c0_16 = arith.constant 0 : index
    %24 = vector.load %arg5[%c0_15, %c0_16] : memref<8x2xf32, #tpu.memory_space<vmem>>, vector<8x2xf32>
    tpu.vector_store %arg5[%c0_15, %c0_16], %23 {strides = array<i32>} : memref<8x2xf32, #tpu.memory_space<vmem>>, vector<8x2xf32>,
    return
  }
}

</mosaic_0001>

<bundles_post_ra>
// kernel: tpu_custom_call.1
= control target key start
LH: loop header
LB: loop body
LE: loop exit
PB: predicated region body
PF: predicated region fallthrough
CT: control target
= control target key end

     0   :  { %10 = vsyncpa [#allocation3], 0  ;;  %s4110_s0 = inlined_call_operand.hbm [shape: f32[8,24], index: 0, kind: input, shape index: {}]   ;;  %s4111_s1 = inlined_call_operand.hbm [shape: bf16[24,800], index: 1, kind: input, shape index: {}]   ;;  %s4112_s2 = inlined_call_operand.hbm [shape: bf16[800,600], index: 2, kind: input, shape index: {}]   ;;  %s4113_s3 = inlined_call_operand.hbm [shape: bf16[2,600], index: 3, kind: input, shape index: {}]   ;;  %s4114_s4 = inlined_call_operand.hbm [shape: f32[1,1664], index: 4, kind: input, shape index: {}]   ;;  %s4115_s5 = inlined_call_operand.vmem [shape: f32[8,2], index: 5, kind: output, shape index: {}]  }
   0x1   :  { %11 = vsyncpa [#allocation5], 0  ;;  %s28_s20 = sshll.u32 %s4111_s1, 4  ;;  %s29_s20 = int_to_ptr.hbm [resolvable:$true] %s28_s20 }
   0x2   :  { %12 = vsyncpa [#allocation8], 0  ;;  %s3922_s21 = smov [#allocation4]   ;;  %s55_s25 = sshll.u32 %s4113_s3, 4  ;;  %s56_s25 = int_to_ptr.hbm [resolvable:$true] %s55_s25 }
   0x3   :  { %s30_s22 = sshll.u32 %s3922_s21, 4  ;;  %s3923_s26 = smov 448   ;;  %s31_s22 = int_to_ptr.vmem [resolvable:$true] %s30_s22 }
   0x4   :  { %s3924_s27 = smov 28   ;;  %s3925_s28 = smov [#allocation7]  }
   0x5   :  { %36 = dma.hbm_to_vmem [thread:$0]  %s29_s20, 1344, %s31_s22, [#allocation5], %s3923_s26, %s3923_s26, %s3924_s27  }
   0x6   :  { %s57_s29 = sshll.u32 %s3925_s28, 4  ;;  %s18_s7 = sshll.u32 %s4110_s0, 4  ;;  %s58_s29 = int_to_ptr.vmem [resolvable:$true] %s57_s29  ;;  %s19_s7 = int_to_ptr.hbm [resolvable:$true] %s18_s7 }
   0x7   :  { %60 = dma.hbm_to_vmem [thread:$0]  %s56_s25, 80, %s58_s29, [#allocation8]  }
   0x8   :  { %s41_s9 = sshll.u32 %s4112_s2, 4  ;;  %s3926_s10 = smov [#allocation2]   ;;  %s42_s9 = int_to_ptr.hbm [resolvable:$true] %s41_s9 }
   0x9   :  { %s20_s11 = sshll.u32 %s3926_s10, 4  ;;  %s3927_s3 = smov [#allocation6]   ;;  %s21_s11 = int_to_ptr.vmem [resolvable:$true] %s20_s11 }
   0xa   :  { %23 = dma.hbm_to_vmem [thread:$0]  %s19_s7, 128, %s21_s11, [#allocation3]  }
   0xb   :  { %s43_s12 = sshll.u32 %s3927_s3, 4  ;;  %s3928_s13 = smov 320   ;;  %s44_s12 = int_to_ptr.vmem [resolvable:$true] %s43_s12 }
   0xc   :  { %s3929_s14 = smov 20   ;;  %s66_s16 = sshll.u32 %s4114_s4, 4  ;;  %s67_s16 = int_to_ptr.hbm [resolvable:$true] %s66_s16 }
   0xd   :  { %49 = dma.hbm_to_vmem [thread:$0]  %s42_s9, 32000, %s44_s12, [#allocation5], %s3928_s13, %s3928_s13, %s3929_s14  }
   0xe   :  { %s3930_s17 = smov [#allocation9]  }
   0xf   :  { %s68_s18 = sshll.u32 %s3930_s17, 4  ;;  %s69_s18 = int_to_ptr.vmem [resolvable:$true] %s68_s18 }
  0x10   :  { %71 = dma.hbm_to_vmem [thread:$0]  %s67_s16, 208, %s69_s18, [#allocation8]  }
  0x11   :  { %3916 = dma.done.wait [#allocation3], 128  }
  0x12   :  { %3917 = vsyncadd [#allocation3], 4294967168 }
  0x13   :  { %3918 = dma.done.wait [#allocation5], 33344  }
  0x14   :  { %3919 = vsyncadd [#allocation5], 4294933952 }
  0x15   :  { %3920 = dma.done.wait [#allocation8], 288  }
  0x16   :  { %3921 = vsyncadd [#allocation8], 4294967008  ;;  %v106_v0 = vld [vmem:[#allocation4 + $0x38] sm:$0xff]  ;;  %v107_v1 = vld [vmem:[#allocation4 + $0x40] sm:$0xff]  ;;  %vm183_vm0 = vcmask 1043456   ;;  %vm179_vm1 = vcmask 195584  }
  0x17   :  { %v151_v2 = vunpack.c.l.b16 %v106_v0  ;;  %v152_v3 = vunpack.c.h.b16 %v106_v0  ;;  %v153_v4 = vunpack.c.l.b16 %v107_v1  ;;  %v154_v5 = vunpack.c.h.b16 %v107_v1  ;;  %v2488_v6 = vld [vmem:[#allocation4] sm:$0xf]  ;;  %v3530_v7 = vld [vmem:[#allocation4 + $0x18] sm:$0xf0]  ;;  %v3527_v8 = vld [vmem:[#allocation4 + $0x4] sm:$0xf] }
  0x18   :  { %v2490_v9 = vld [vmem:[#allocation4 + $0x1c] sm:$0xf0]  ;;  %v2496_v14 = vld [vmem:[#allocation4 + $0x8] sm:$0xf]  ;;  %v3531_v15 = vld [vmem:[#allocation4 + $0x20] sm:$0xf0]  ;;  %v2489_v17 = vor.u32 %v3530_v7, %v2488_v6 }
  0x19   :  { %v165_v10 = vpack.c.b16 %v151_v2, %v151_v2  ;;  %v166_v11 = vpack.c.b16 %v152_v3, %v152_v3  ;;  %v167_v12 = vpack.c.b16 %v153_v4, %v153_v4  ;;  %v168_v13 = vpack.c.b16 %v154_v5, %v154_v5  ;;  %v108_v16 = vld [vmem:[#allocation4 + $0x48] sm:$0xff]  ;;  %v109_v21 = vld [vmem:[#allocation4 + $0x50] sm:$0xf]  ;;  %v96_v27 = vld [vmem:[#allocation2] sm:$0xff] }
  0x1a   :  { %v3528_v18 = vld [vmem:[#allocation4 + $0xc] sm:$0xf]  ;;  %v2498_v19 = vld [vmem:[#allocation4 + $0x24] sm:$0xf0]  ;;  %v155_v20 = vunpack.c.l.b16 %v108_v16  ;;  %v2493_v26 = vor.u32 %v3527_v8, %v2490_v9  ;;  %v156_v29 = vunpack.c.h.b16 %v108_v16  ;;  %v157_v30 = vunpack.c.l.b16 %v109_v21  ;;  %v2504_v33 = vld [vmem:[#allocation4 + $0x10] sm:$0xf] }
  0x1b   :  { %v185_v22 = vsel %vm183_vm0, %v165_v10, 0  ;;  %v188_v23 = vsel %vm183_vm0, %v166_v11, 0  ;;  %v191_v24 = vsel %vm183_vm0, %v167_v12, 0  ;;  %v194_v25 = vsel %vm183_vm0, %v168_v13, 0  ;;  %v3532_v36 = vld [vmem:[#allocation4 + $0x28] sm:$0xf0] }
  0x1c   :  { %211 = vmatpush.bf16.msra.mxu0 %v185_v22  ;;  %224 = vmatpush.bf16.msra.mxu1 %v188_v23  ;;  %v169_v28 = vpack.c.b16 %v155_v20, %v155_v20  ;;  %v2497_v31 = vor.u32 %v3531_v15, %v2496_v14  ;;  %v2501_v32 = vor.u32 %v3528_v18, %v2498_v19  ;;  %v2663_v37 = vld [vmem:[#allocation6 + $0x118] sm:$0xf]  ;;  %v3571_v38 = vld [vmem:[#allocation6 + $0x128] sm:$0xf0]  ;;  %v3529_v41 = vld [vmem:[#allocation4 + $0x14] sm:$0xf] }
  0x1d   :  { %237 = vmatpush.bf16.msra.mxu2 %v191_v24  ;;  %250 = vmatpush.bf16.msra.mxu3 %v194_v25  ;;  %v170_v34 = vpack.c.b16 %v156_v29, %v156_v29  ;;  %v171_v35 = vpack.c.b16 %v157_v30, %v157_v30  ;;  %v3980_v39 = vpack.c.bf16 %v96_v27, %v96_v27  ;;  %v2506_v42 = vld [vmem:[#allocation4 + $0x2c] sm:$0xf0]  ;;  %v2823_v44 = vld [vmem:[#allocation6 + $0x258] sm:$0xf]  ;;  %v3611_v45 = vld [vmem:[#allocation6 + $0x268] sm:$0xf0] }
  0x1e   :  { %v197_v40 = vsel %vm183_vm0, %v169_v28, 0  ;;  %v2512_v46 = vld [vmem:[#allocation4 + $0x18] sm:$0xf]  ;;  %v3533_v47 = vld [vmem:[#allocation4 + $0x30] sm:$0xf0]  ;;  %v2664_v48 = vor.u32 %v3571_v38, %v2663_v37  ;;  %v2505_v50 = vor.u32 %v3532_v36, %v2504_v33  ;;  %v2509_v51 = vor.u32 %v3529_v41, %v2506_v42 }
  0x1f   :  { %v200_v43 = vsel %vm183_vm0, %v170_v34, 0  ;;  %v203_v49 = vsel %vm183_vm0, %v171_v35, 0  ;;  %v2643_v52 = vld [vmem:[#allocation6 + $0xf0] sm:$0xf]  ;;  %v3566_v53 = vld [vmem:[#allocation6 + $0x100] sm:$0xf0]  ;;  %v2824_v54 = vor.u32 %v3611_v45, %v2823_v44  ;;  %v2513_v59 = vor.u32 %v3533_v47, %v2512_v46 }
  0x20   :  { %212 = vmatpush.bf16.msra.mxu0 %v2489_v17  ;;  %225 = vmatpush.bf16.msra.mxu1 %v2493_v26  ;;  %v3143_v55 = vld [vmem:[#allocation6 + $0x4d8] sm:$0xf]  ;;  %v3691_v56 = vld [vmem:[#allocation6 + $0x4e8] sm:$0xf0]  ;;  %v2803_v57 = vld [vmem:[#allocation6 + $0x230] sm:$0xf]  ;;  %v2644_v60 = vor.u32 %v3566_v53, %v2643_v52 }
  0x21   :  { %238 = vmatpush.bf16.msra.mxu2 %v2497_v31  ;;  %251 = vmatpush.bf16.msra.mxu3 %v2501_v32  ;;  %v3606_v58 = vld [vmem:[#allocation6 + $0x240] sm:$0xf0]  ;;  %v3144_v61 = vor.u32 %v3691_v56, %v3143_v55  ;;  %v2623_v62 = vld [vmem:[#allocation6 + $0xc8] sm:$0xf]  ;;  %v3561_v63 = vld [vmem:[#allocation6 + $0xd8] sm:$0xf0] }
  0x22   :  { %v2804_v0 = vor.u32 %v3606_v58, %v2803_v57  ;;  %v3123_v1 = vld [vmem:[#allocation6 + $0x4b0] sm:$0xf]  ;;  %v3686_v2 = vld [vmem:[#allocation6 + $0x4c0] sm:$0xf0]  ;;  %v2783_v3 = vld [vmem:[#allocation6 + $0x208] sm:$0xf]  ;;  %v2624_v5 = vor.u32 %v3561_v63, %v2623_v62 }
  0x23   :  { %2514 = vmatmul.msk.bf16.vlgmr.msra.gmra.mxu0 %vm179_vm1, %v3980_v39  ;;  %2515 = vmatmul.msk.bf16.vlgmr.msra.gmra.mxu1 %vm179_vm1, %v3980_v39  ;;  %v3601_v4 = vld [vmem:[#allocation6 + $0x218] sm:$0xf0]  ;;  %v3124_v6 = vor.u32 %v3686_v2, %v3123_v1  ;;  %v2603_v7 = vld [vmem:[#allocation6 + $0xa0] sm:$0xf]  ;;  %v3556_v8 = vld [vmem:[#allocation6 + $0xb0] sm:$0xf0] }
  0x24   :  { %263 = vmatpush.bf16.msrb.mxu0 %v197_v40  ;;  %276 = vmatpush.bf16.msrb.mxu1 %v200_v43  ;;  %v2784_v9 = vor.u32 %v3601_v4, %v2783_v3  ;;  %v3103_v10 = vld [vmem:[#allocation6 + $0x488] sm:$0xf]  ;;  %v3681_v11 = vld [vmem:[#allocation6 + $0x498] sm:$0xf0]  ;;  %v2604_v12 = vor.u32 %v3556_v8, %v2603_v7  ;;  %v2763_v13 = vld [vmem:[#allocation6 + $0x1e0] sm:$0xf] }
  0x25   :  { %2516 = vmatmul.msk.bf16.vlgmr.msra.gmra.mxu2 %vm179_vm1, %v3980_v39  ;;  %2517 = vmatmul.msk.bf16.vlgmr.msra.gmra.mxu3 %vm179_vm1, %v3980_v39  ;;  %v3596_v14 = vld [vmem:[#allocation6 + $0x1f0] sm:$0xf0]  ;;  %v2983_v15 = vld [vmem:[#allocation6 + $0x398] sm:$0xf]  ;;  %v3104_v16 = vor.u32 %v3681_v11, %v3103_v10  ;;  %v3551_v18 = vld [vmem:[#allocation6 + $0x88] sm:$0xf0] }
  0x26   :  { %289 = vmatpush.bf16.msrb.mxu2 %v203_v49  ;;  %1925 = vmatpush.bf16.msrb.mxu3 %v2664_v48  ;;  %v2583_v17 = vld [vmem:[#allocation6 + $0x78] sm:$0xf]  ;;  %v3651_v19 = vld [vmem:[#allocation6 + $0x3a8] sm:$0xf0]  ;;  %v3083_v20 = vld [vmem:[#allocation6 + $0x460] sm:$0xf]  ;;  %v2764_v23 = vor.u32 %v3596_v14, %v2763_v13 }
  0x27   :  { %v3676_v21 = vld [vmem:[#allocation6 + $0x470] sm:$0xf0]  ;;  %v2984_v22 = vor.u32 %v3651_v19, %v2983_v15  ;;  %v2963_v24 = vld [vmem:[#allocation6 + $0x370] sm:$0xf]  ;;  %v3646_v25 = vld [vmem:[#allocation6 + $0x380] sm:$0xf0]  ;;  %v2584_v26 = vor.u32 %v3551_v18, %v2583_v17 }
  0x28   :  { %264 = vmatpush.bf16.msrb.mxu0 %v2505_v50  ;;  %277 = vmatpush.bf16.msrb.mxu1 %v2509_v51  ;;  %v2743_v27 = vld [vmem:[#allocation6 + $0x1b8] sm:$0xf]  ;;  %v3591_v28 = vld [vmem:[#allocation6 + $0x1c8] sm:$0xf0]  ;;  %v2964_v29 = vor.u32 %v3646_v25, %v2963_v24  ;;  %v3084_v30 = vor.u32 %v3676_v21, %v3083_v20  ;;  %v2563_v31 = vld [vmem:[#allocation6 + $0x50] sm:$0xf] }
  0x29   :  { %v3546_v32 = vld [vmem:[#allocation6 + $0x60] sm:$0xf0]  ;;  %v3063_v33 = vld [vmem:[#allocation6 + $0x438] sm:$0xf]  ;;  %v3671_v34 = vld [vmem:[#allocation6 + $0x448] sm:$0xf0]  ;;  %v2744_v36 = vor.u32 %v3591_v28, %v2743_v27 }
  0x2a   :  { %290 = vmatpush.bf16.msrb.mxu2 %v2513_v59  ;;  %1926 = vmatpush.bf16.msrb.mxu3 %v2644_v60  ;;  %v2943_v35 = vld [vmem:[#allocation6 + $0x348] sm:$0xf]  ;;  %v3641_v37 = vld [vmem:[#allocation6 + $0x358] sm:$0xf0]  ;;  %v2564_v38 = vor.u32 %v3546_v32, %v2563_v31  ;;  %v2723_v40 = vld [vmem:[#allocation6 + $0x190] sm:$0xf]  ;;  %v3064_v44 = vor.u32 %v3671_v34, %v3063_v33 }
  0x2b   :  { %v3586_v41 = vld [vmem:[#allocation6 + $0x1a0] sm:$0xf0]  ;;  %v2543_v42 = vld [vmem:[#allocation6 + $0x28] sm:$0xf]  ;;  %v2944_v43 = vor.u32 %v3641_v37, %v2943_v35  ;;  %v3541_v45 = vld [vmem:[#allocation6 + $0x38] sm:$0xf0] }
  0x2c   :  { %1938 = vmatpush.bf16.msra.mxu0 %v2824_v54  ;;  %1951 = vmatpush.bf16.msra.mxu1 %v2984_v22  ;;  %v2923_v46 = vld [vmem:[#allocation6 + $0x320] sm:$0xf]  ;;  %v3636_v47 = vld [vmem:[#allocation6 + $0x330] sm:$0xf0]  ;;  %v3043_v48 = vld [vmem:[#allocation6 + $0x410] sm:$0xf]  ;;  %v2724_v50 = vor.u32 %v3586_v41, %v2723_v40  ;;  %v2544_v51 = vor.u32 %v3541_v45, %v2543_v42 }
  0x2d   :  { %v3666_v49 = vld [vmem:[#allocation6 + $0x420] sm:$0xf0]  ;;  %v3581_v52 = vld [vmem:[#allocation6 + $0x178] sm:$0xf0]  ;;  %v2523_v53 = vld [vmem:[#allocation6] sm:$0xf]  ;;  %v2924_v55 = vor.u32 %v3636_v47, %v2923_v46 }
  0x2e   :  { %1964 = vmatpush.bf16.msra.mxu2 %v3144_v61  ;;  %1927 = vmatpush.bf16.msrb.mxu3 %v2624_v5  ;;  %v3536_v54 = vld [vmem:[#allocation6 + $0x10] sm:$0xf0]  ;;  %v3044_v56 = vor.u32 %v3666_v49, %v3043_v48  ;;  %v3303_v57 = vld [vmem:[#allocation6 + $0x618] sm:$0xf]  ;;  %v3631_v59 = vld [vmem:[#allocation6 + $0x308] sm:$0xf0] }
  0x2f   :  { %v2903_v58 = vld [vmem:[#allocation6 + $0x2f8] sm:$0xf]  ;;  %v3731_v60 = vld [vmem:[#allocation6 + $0x628] sm:$0xf0]  ;;  %v3023_v61 = vld [vmem:[#allocation6 + $0x3e8] sm:$0xf]  ;;  %v2524_v1 = vor.u32 %v3536_v54, %v2523_v53 }
  0x30   :  { %1939 = vmatpush.bf16.msra.mxu0 %v2804_v0  ;;  %1952 = vmatpush.bf16.msra.mxu1 %v2964_v29  ;;  %v3661_v62 = vld [vmem:[#allocation6 + $0x3f8] sm:$0xf0]  ;;  %v2683_v0 = vld [vmem:[#allocation6 + $0x140] sm:$0xf]  ;;  %v3576_v2 = vld [vmem:[#allocation6 + $0x150] sm:$0xf0]  ;;  %v2904_v5 = vor.u32 %v3631_v59, %v2903_v58 }
  0x31   :  { %v3463_v3 = vld [vmem:[#allocation6 + $0x758] sm:$0xf]  ;;  %v3771_v4 = vld [vmem:[#allocation6 + $0x768] sm:$0xf0]  ;;  %v3024_v7 = vor.u32 %v3661_v62, %v3023_v61  ;;  %v3283_v8 = vld [vmem:[#allocation6 + $0x5f0] sm:$0xf]  ;;  %v2684_v14 = vor.u32 %v3576_v2, %v2683_v0 }
  0x32   :  { %1965 = vmatpush.bf16.msra.mxu2 %v3124_v6  ;;  %1928 = vmatpush.bf16.msrb.mxu3 %v2604_v12  ;;  %v3304_v6 = vor.u32 %v3731_v60, %v3303_v57  ;;  %v3626_v10 = vld [vmem:[#allocation6 + $0x2e0] sm:$0xf0]  ;;  %v3003_v12 = vld [vmem:[#allocation6 + $0x3c0] sm:$0xf]  ;;  %v3656_v13 = vld [vmem:[#allocation6 + $0x3d0] sm:$0xf0]  ;;  %v3464_v17 = vor.u32 %v3771_v4, %v3463_v3 }
  0x33   :  { %2518 = vmatmul.msk.bf16.vlgmr.msrb.gmra.mxu0 %vm179_vm1, %v3980_v39  ;;  %2519 = vmatmul.msk.bf16.vlgmr.msrb.gmra.mxu1 %vm179_vm1, %v3980_v39  ;;  %v3726_v11 = vld [vmem:[#allocation6 + $0x600] sm:$0xf0]  ;;  %v3569_v15 = vld [vmem:[#allocation6 + $0x11c] sm:$0xf]  ;;  %v3443_v20 = vld [vmem:[#allocation6 + $0x730] sm:$0xf]  ;;  %v3004_v22 = vor.u32 %v3656_v13, %v3003_v12 }
  0x34   :  { %1940 = vmatpush.bf16.msra.mxu0 %v2784_v9  ;;  %1953 = vmatpush.bf16.msra.mxu1 %v2944_v43  ;;  %v2883_v9 = vld [vmem:[#allocation6 + $0x2d0] sm:$0xf]  ;;  %v3284_v19 = vor.u32 %v3726_v11, %v3283_v8  ;;  %v3766_v21 = vld [vmem:[#allocation6 + $0x740] sm:$0xf0]  ;;  %v3263_v24 = vld [vmem:[#allocation6 + $0x5c8] sm:$0xf] }
  0x35   :  { %2520 = vmatmul.msk.bf16.vlgmr.msrb.gmra.mxu2 %vm179_vm1, %v3980_v39  ;;  %v2703_v39 = vld [vmem:[#allocation6 + $0x168] sm:$0xf]  ;;  %v2884_v18 = vor.u32 %v3626_v10, %v2883_v9  ;;  %v3721_v25 = vld [vmem:[#allocation6 + $0x5d8] sm:$0xf0]  ;;  %v3444_v28 = vor.u32 %v3766_v21, %v3443_v20  ;;  %v3243_v33 = vld [vmem:[#allocation6 + $0x5a0] sm:$0xf] }
  0x36   :  { %1966 = vmatpush.bf16.msra.mxu2 %v3104_v16  ;;  %1929 = vmatpush.bf16.msrb.mxu3 %v2584_v26  ;;  %v2704_v63 = vor.u32 %v3581_v52, %v2703_v39  ;;  %v2665_v16 = vld [vmem:[#allocation6 + $0x12c] sm:$0xf0]  ;;  %v3564_v26 = vld [vmem:[#allocation6 + $0xf4] sm:$0xf]  ;;  %v2645_v27 = vld [vmem:[#allocation6 + $0x104] sm:$0xf0]  ;;  %v3264_v29 = vor.u32 %v3721_v25, %v3263_v24 }
  0x37   :  { %v3761_v31 = vld [vmem:[#allocation6 + $0x718] sm:$0xf0]  ;;  %v2648_v32 = vor.u32 %v3564_v26, %v2645_v27  ;;  %v3716_v34 = vld [vmem:[#allocation6 + $0x5b0] sm:$0xf0]  ;;  %v3559_v35 = vld [vmem:[#allocation6 + $0xcc] sm:$0xf] }
  0x38   :  { %1941 = vmatpush.bf16.msra.mxu0 %v2764_v23  ;;  %1954 = vmatpush.bf16.msra.mxu1 %v2924_v55  ;;  %v2668_v23 = vor.u32 %v3569_v15, %v2665_v16  ;;  %v3403_v40 = vld [vmem:[#allocation6 + $0x6e0] sm:$0xf]  ;;  %v3756_v41 = vld [vmem:[#allocation6 + $0x6f0] sm:$0xf0]  ;;  %v3223_v43 = vld [vmem:[#allocation6 + $0x578] sm:$0xf] }
  0x39   :  { %v3554_v45 = vld [vmem:[#allocation6 + $0xa4] sm:$0xf]  ;;  %v2605_v46 = vld [vmem:[#allocation6 + $0xb4] sm:$0xf0]  ;;  %v3404_v47 = vor.u32 %v3756_v41, %v3403_v40  ;;  %v3363_v55 = vld [vmem:[#allocation6 + $0x690] sm:$0xf] }
  0x3a   :  { %1967 = vmatpush.bf16.msra.mxu2 %v3084_v30  ;;  %1930 = vmatpush.bf16.msrb.mxu3 %v2564_v38  ;;  %v3423_v30 = vld [vmem:[#allocation6 + $0x708] sm:$0xf]  ;;  %v3244_v38 = vor.u32 %v3716_v34, %v3243_v33  ;;  %v3383_v49 = vld [vmem:[#allocation6 + $0x6b8] sm:$0xf]  ;;  %v2608_v39 = vor.u32 %v3554_v45, %v2605_v46  ;;  %v3706_v52 = vld [vmem:[#allocation6 + $0x560] sm:$0xf0] }
  0x3b   :  { %v3424_v37 = vor.u32 %v3761_v31, %v3423_v30  ;;  %v3549_v58 = vld [vmem:[#allocation6 + $0x7c] sm:$0xf]  ;;  %v2585_v59 = vld [vmem:[#allocation6 + $0x8c] sm:$0xf0]  ;;  %v3183_v61 = vld [vmem:[#allocation6 + $0x528] sm:$0xf] }
  0x3c   :  { %1942 = vmatpush.bf16.msra.mxu0 %v2744_v36  ;;  %1955 = vmatpush.bf16.msra.mxu1 %v2904_v5  ;;  %v2625_v36 = vld [vmem:[#allocation6 + $0xdc] sm:$0xf0]  ;;  %v2588_v60 = vor.u32 %v3549_v58, %v2585_v59  ;;  %v3701_v62 = vld [vmem:[#allocation6 + $0x538] sm:$0xf0]  ;;  %v3343_v0 = vld [vmem:[#allocation6 + $0x668] sm:$0xf] }
  0x3d   :  { %v2628_v42 = vor.u32 %v3559_v35, %v2625_v36  ;;  %v2863_v2 = vld [vmem:[#allocation6 + $0x2a8] sm:$0xf]  ;;  %v3621_v4 = vld [vmem:[#allocation6 + $0x2b8] sm:$0xf0]  ;;  %v3544_v5 = vld [vmem:[#allocation6 + $0x54] sm:$0xf] }
  0x3e   :  { %1968 = vmatpush.bf16.msra.mxu2 %v3064_v44  ;;  %1931 = vmatpush.bf16.msrb.mxu3 %v2544_v51  ;;  %v3711_v44 = vld [vmem:[#allocation6 + $0x588] sm:$0xf0]  ;;  %v3203_v51 = vld [vmem:[#allocation6 + $0x550] sm:$0xf]  ;;  %v3163_v9 = vld [vmem:[#allocation6 + $0x500] sm:$0xf] }
  0x3f   :  { %v3224_v48 = vor.u32 %v3711_v44, %v3223_v43  ;;  %v3204_v54 = vor.u32 %v3706_v52, %v3203_v51  ;;  %v3696_v10 = vld [vmem:[#allocation6 + $0x510] sm:$0xf0]  ;;  %v3323_v11 = vld [vmem:[#allocation6 + $0x640] sm:$0xf]  ;;  %v3539_v20 = vld [vmem:[#allocation6 + $0x2c] sm:$0xf] }
  0x40   :  { %1943 = vmatpush.bf16.msra.mxu0 %v2724_v50  ;;  %1956 = vmatpush.bf16.msra.mxu1 %v2884_v18  ;;  %v3751_v50 = vld [vmem:[#allocation6 + $0x6c8] sm:$0xf0]  ;;  %v3164_v12 = vor.u32 %v3696_v10, %v3163_v9  ;;  %v3736_v13 = vld [vmem:[#allocation6 + $0x650] sm:$0xf0]  ;;  %v3503_v18 = vld [vmem:[#allocation6 + $0x7a8] sm:$0xf] }
  0x41   :  { %v3384_v53 = vor.u32 %v3751_v50, %v3383_v49  ;;  %v3324_v15 = vor.u32 %v3736_v13, %v3323_v11  ;;  %v3616_v16 = vld [vmem:[#allocation6 + $0x290] sm:$0xf0]  ;;  %v3483_v24 = vld [vmem:[#allocation6 + $0x780] sm:$0xf]  ;;  %v3534_v26 = vld [vmem:[#allocation6 + $0x4] sm:$0xf] }
  0x42   :  { %1969 = vmatpush.bf16.msra.mxu2 %v3044_v56  ;;  %1932 = vmatpush.bf16.msrb.mxu3 %v2524_v1  ;;  %v3746_v56 = vld [vmem:[#allocation6 + $0x6a0] sm:$0xf0]  ;;  %v3741_v1 = vld [vmem:[#allocation6 + $0x678] sm:$0xf0]  ;;  %v3776_v25 = vld [vmem:[#allocation6 + $0x790] sm:$0xf0] }
  0x43   :  { %v3364_v57 = vor.u32 %v3746_v56, %v3363_v55  ;;  %v3344_v3 = vor.u32 %v3741_v1, %v3343_v0  ;;  %v2525_v27 = vld [vmem:[#allocation6 + $0x14] sm:$0xf0]  ;;  %v3649_v35 = vld [vmem:[#allocation6 + $0x39c] sm:$0xf]  ;;  %v3145_v41 = vld [vmem:[#allocation6 + $0x4ec] sm:$0xf0] }
  0x44   :  { %1944 = vmatpush.bf16.msra.mxu0 %v2704_v63  ;;  %v3184_v63 = vor.u32 %v3701_v62, %v3183_v61  ;;  %v3999_v30 = vld [vmem:[#allocation9] sm:$0x7f]  ;;  %v2965_v49 = vld [vmem:[#allocation6 + $0x384] sm:$0xf0]  ;;  %v3305_v0 = vld [vmem:[#allocation6 + $0x62c] sm:$0xf0] }
  0x45   :  { %v111_v31 = vperm.slane %v3999_v30, 0  ;;  %v3689_v40 = vld [vmem:[#allocation6 + $0x4dc] sm:$0xf]  ;;  %v113_v44 = vperm.slane %v3999_v30, 2  ;;  %v114_v45 = vperm.slane %v3999_v30, 3  ;;  %v115_v10 = vperm.slane %v3999_v30, 4 }
  0x46   :  { %1977 = vmatpush.bf16.msra.mxu3 %v3304_v6  ;;  %1970 = vmatpush.bf16.msra.mxu2 %v3024_v7  ;;  %v2565_v6 = vld [vmem:[#allocation6 + $0x64] sm:$0xf0]  ;;  %v2864_v7 = vor.u32 %v3621_v4, %v2863_v2  ;;  %v3684_v51 = vld [vmem:[#allocation6 + $0x4b4] sm:$0xf]  ;;  %v3609_v56 = vld [vmem:[#allocation6 + $0x25c] sm:$0xf] }
  0x47   :  { %v2568_v8 = vor.u32 %v3544_v5, %v2565_v6  ;;  %v3125_v52 = vld [vmem:[#allocation6 + $0x4c4] sm:$0xf0]  ;;  %v3729_v58 = vld [vmem:[#allocation6 + $0x61c] sm:$0xf]  ;;  %v3639_v1 = vld [vmem:[#allocation6 + $0x34c] sm:$0xf] }
  0x48   :  { %1945 = vmatpush.bf16.msra.mxu0 %v2684_v14  ;;  %1957 = vmatpush.bf16.msra.mxu1 %v2864_v7  ;;  %v2843_v14 = vld [vmem:[#allocation6 + $0x280] sm:$0xf]  ;;  %v116_v11 = vperm.slane %v3999_v30, 5  ;;  %v2805_v13 = vld [vmem:[#allocation6 + $0x244] sm:$0xf0]  ;;  %vm1921_vm2 = vcmask 261120  }
  0x49   :  { %v2945_v2 = vld [vmem:[#allocation6 + $0x35c] sm:$0xf0]  ;;  %vm2405_vm3 = vcmask 719872   ;;  %vm2477_vm4 = vcmask 15360  }
  0x4a   :  { %1978 = vmatpush.bf16.msra.mxu3 %v3284_v19  ;;  %1971 = vmatpush.bf16.msra.mxu2 %v3004_v22  ;;  %v3781_v19 = vld [vmem:[#allocation6 + $0x7b8] sm:$0xf0]  ;;  %v2545_v22 = vld [vmem:[#allocation6 + $0x3c] sm:$0xf0]  ;;  %v2948_v9 = vor.u32 %v3639_v1, %v2945_v2  ;;  %v2745_v1 = vld [vmem:[#allocation6 + $0x1cc] sm:$0xf0] }
  0x4b   :  { %v3504_v21 = vor.u32 %v3781_v19, %v3503_v18  ;;  %v3105_v4 = vld [vmem:[#allocation6 + $0x49c] sm:$0xf0]  ;;  %v3285_v18 = vld [vmem:[#allocation6 + $0x604] sm:$0xf0]  ;;  %v3634_v19 = vld [vmem:[#allocation6 + $0x324] sm:$0xf] }
  0x4c   :  { %1990 = vmatpush.bf16.msrb.mxu0 %v3464_v17  ;;  %v2844_v17 = vor.u32 %v3616_v16, %v2843_v14  ;;  %v3709_v2 = vld [vmem:[#allocation6 + $0x57c] sm:$0xf] }
  0x4e   :  { %2016 = vmatpush.bf16.msrb.mxu2 %v2668_v23  ;;  %1979 = vmatpush.bf16.msra.mxu3 %v3264_v29  ;;  %v2548_v23 = vor.u32 %v3539_v20, %v2545_v22  ;;  %v2528_v29 = vor.u32 %v3534_v26, %v2525_v27  ;;  %v2925_v20 = vld [vmem:[#allocation6 + $0x334] sm:$0xf0]  ;;  %v3599_v27 = vld [vmem:[#allocation6 + $0x20c] sm:$0xf] }
  0x4f   :  { %1958 = vmatpush.bf16.msra.mxu1 %v2844_v17  ;;  %v3724_v17 = vld [vmem:[#allocation6 + $0x5f4] sm:$0xf]  ;;  %v3085_v22 = vld [vmem:[#allocation6 + $0x474] sm:$0xf0] }
  0x50   :  { %1991 = vmatpush.bf16.msrb.mxu0 %v3444_v28  ;;  %v3484_v28 = vor.u32 %v3776_v25, %v3483_v24  ;;  %v3288_v26 = vor.u32 %v3724_v17, %v3285_v18  ;;  %v3584_v17 = vld [vmem:[#allocation6 + $0x194] sm:$0xf] }
  0x52   :  { %2017 = vmatpush.bf16.msrb.mxu2 %v2648_v32  ;;  %1980 = vmatpush.bf16.msra.mxu3 %v3244_v38  ;;  %v112_v32 = vperm.slane %v3999_v30, 1  ;;  %v2985_v38 = vld [vmem:[#allocation6 + $0x3ac] sm:$0xf0] }
  0x53   :  { %2009 = vmatpush.bf16.msrb.mxu1 %v3504_v21  ;;  %v2988_v46 = vor.u32 %v3649_v35, %v2985_v38  ;;  %v3674_v21 = vld [vmem:[#allocation6 + $0x464] sm:$0xf]  ;;  %v3265_v35 = vld [vmem:[#allocation6 + $0x5dc] sm:$0xf0]  ;;  %v3629_v38 = vld [vmem:[#allocation6 + $0x2fc] sm:$0xf] }
  0x54   :  { %1992 = vmatpush.bf16.msrb.mxu0 %v3424_v37 }
  0x56   :  { %2018 = vmatpush.bf16.msrb.mxu2 %v2628_v42  ;;  %1981 = vmatpush.bf16.msra.mxu3 %v3224_v48  ;;  %v3644_v48 = vld [vmem:[#allocation6 + $0x374] sm:$0xf] }
  0x57   :  { %2010 = vmatpush.bf16.msrb.mxu1 %v3484_v28  ;;  %v2968_v55 = vor.u32 %v3644_v48, %v2965_v49  ;;  %v2785_v28 = vld [vmem:[#allocation6 + $0x21c] sm:$0xf0]  ;;  %v3594_v48 = vld [vmem:[#allocation6 + $0x1e4] sm:$0xf]  ;;  %v2765_v49 = vld [vmem:[#allocation6 + $0x1f4] sm:$0xf0] }
  0x58   :  { %1993 = vmatpush.bf16.msrb.mxu0 %v3404_v47  ;;  %v3148_v47 = vor.u32 %v3689_v40, %v3145_v41  ;;  %v2788_v40 = vor.u32 %v3599_v27, %v2785_v28  ;;  %v2905_v41 = vld [vmem:[#allocation6 + $0x30c] sm:$0xf0]  ;;  %v3005_v27 = vld [vmem:[#allocation6 + $0x3d4] sm:$0xf0]  ;;  %v3779_v28 = vld [vmem:[#allocation6 + $0x7ac] sm:$0xf] }
  0x5a   :  { %2019 = vmatpush.bf16.msrb.mxu2 %v2608_v39  ;;  %1982 = vmatpush.bf16.msra.mxu3 %v3204_v54 }
  0x5c   :  { %1994 = vmatpush.bf16.msrb.mxu0 %v3384_v53 }
  0x5e   :  { %2020 = vmatpush.bf16.msrb.mxu2 %v2588_v60  ;;  %1983 = vmatpush.bf16.msra.mxu3 %v3184_v63  ;;  %v3128_v63 = vor.u32 %v3684_v51, %v3125_v52  ;;  %v3714_v51 = vld [vmem:[#allocation6 + $0x5a4] sm:$0xf]  ;;  %v3245_v52 = vld [vmem:[#allocation6 + $0x5b4] sm:$0xf0] }
  0x60   :  { %1995 = vmatpush.bf16.msrb.mxu0 %v3364_v57  ;;  %v2825_v57 = vld [vmem:[#allocation6 + $0x26c] sm:$0xf0] }
  0x61   :  { %v2828_v7 = vor.u32 %v3609_v56, %v2825_v57  ;;  %v3624_v57 = vld [vmem:[#allocation6 + $0x2d4] sm:$0xf] }
  0x62   :  { %2021 = vmatpush.bf16.msrb.mxu2 %v2568_v8  ;;  %1984 = vmatpush.bf16.msra.mxu3 %v3164_v12  ;;  %v3308_v8 = vor.u32 %v3729_v58, %v3305_v0  ;;  %v3604_v12 = vld [vmem:[#allocation6 + $0x234] sm:$0xf]  ;;  %v2885_v58 = vld [vmem:[#allocation6 + $0x2e4] sm:$0xf0] }
  0x63   :  { %v2808_v25 = vor.u32 %v3604_v12, %v2805_v13  ;;  %v3025_v12 = vld [vmem:[#allocation6 + $0x3fc] sm:$0xf0] }
  0x64   :  { %1996 = vmatpush.bf16.msrb.mxu0 %v3344_v3  ;;  %v3679_v3 = vld [vmem:[#allocation6 + $0x48c] sm:$0xf] }
  0x65   :  { %v3108_v16 = vor.u32 %v3679_v3, %v3105_v4  ;;  %v3225_v3 = vld [vmem:[#allocation6 + $0x58c] sm:$0xf0] }
  0x66   :  { %2022 = vmatpush.bf16.msrb.mxu2 %v2548_v23 }
  0x68   :  { %1997 = vmatpush.bf16.msrb.mxu0 %v3324_v15 }
  0x6a   :  { %2023 = vmatpush.bf16.msrb.mxu2 %v2528_v29 }
  0xa0   :  { %v214_v33 = vpop.f32.mrf.mxu0  ;;  %v227_v34 = vpop.f32.mrf.mxu1 }
  0xa1   :  { %v215_v36 = vadd.f32 %v214_v33, %v111_v31  ;;  %v228_v37 = vadd.f32 %v227_v34, %v112_v32  ;;  %v2928_v32 = vor.u32 %v3634_v19, %v2925_v20  ;;  %v3088_v33 = vor.u32 %v3674_v21, %v3085_v22  ;;  %v3719_v34 = vld [vmem:[#allocation6 + $0x5cc] sm:$0xf]  ;;  %v2725_v19 = vld [vmem:[#allocation6 + $0x1a4] sm:$0xf0]  ;;  %v3704_v20 = vld [vmem:[#allocation6 + $0x554] sm:$0xf] }
  0xa2   :  { %v3205_v21 = vld [vmem:[#allocation6 + $0x564] sm:$0xf0] }
  0xa3   :  { %v296_v42 = vmax.f32 %v215_v36, 0.0  ;;  %v297_v43 = vmax.f32 %v228_v37, 0.0 }
  0xa5   :  { %v4005_v50 = vpack.c.bf16 %v296_v42, %v296_v42  ;;  %v4007_v39 = vpack.c.bf16 %v297_v43, %v297_v43  ;;  %v3669_v42 = vld [vmem:[#allocation6 + $0x43c] sm:$0xf]  ;;  %v3065_v43 = vld [vmem:[#allocation6 + $0x44c] sm:$0xf0] }
  0xa6   :  { %v3068_v56 = vor.u32 %v3669_v42, %v3065_v43 }
  0xa7   :  { %1933 = vmatmul.bf16.vlgmr.msrb.gmra.mxu3 %v4005_v50  ;;  %1946 = vmatmul.bf16.vlgmr.msra.gmra.mxu0 %v4007_v39 }
  0xa8   :  { %v240_v53 = vpop.f32.mrf.mxu2  ;;  %v253_v54 = vpop.f32.mrf.mxu3  ;;  %2042 = vmatpush.bf16.msrb.mxu3 %v2988_v46  ;;  %2055 = vmatpush.bf16.msra.mxu0 %v3148_v47  ;;  %v3268_v46 = vor.u32 %v3719_v34, %v3265_v35  ;;  %v117_v47 = vperm.slane %v3999_v30, 6  ;;  %v2768_v30 = vor.u32 %v3594_v48, %v2765_v49  ;;  %v2671_v34 = vld [vmem:[#allocation6 + $0x120] sm:$0xf]  ;;  %v3572_v35 = vld [vmem:[#allocation6 + $0x130] sm:$0xf0] }
  0xa9   :  { %v241_v59 = vadd.f32 %v240_v53, %v113_v44  ;;  %v254_v60 = vadd.f32 %v253_v54, %v114_v45  ;;  %v216_v61 = vpop.f32.mrf.mxu0  ;;  %v229_v62 = vpop.f32.mrf.mxu1 }
  0xaa   :  { %v3248_v62 = vor.u32 %v3714_v51, %v3245_v52  ;;  %v3567_v51 = vld [vmem:[#allocation6 + $0x108] sm:$0xf0]  ;;  %v3574_v52 = vld [vmem:[#allocation6 + $0x144] sm:$0xf] }
  0xab   :  { %v298_v5 = vmax.f32 %v241_v59, 0.0  ;;  %v299_v6 = vmax.f32 %v254_v60, 0.0  ;;  %v3664_v59 = vld [vmem:[#allocation6 + $0x414] sm:$0xf]  ;;  %v3045_v60 = vld [vmem:[#allocation6 + $0x424] sm:$0xf0] }
  0xac   :  { %2043 = vmatpush.bf16.msrb.mxu3 %v2968_v55  ;;  %2056 = vmatpush.bf16.msra.mxu0 %v3128_v63  ;;  %v2908_v55 = vor.u32 %v3629_v38, %v2905_v41  ;;  %v3589_v63 = vld [vmem:[#allocation6 + $0x1bc] sm:$0xf]  ;;  %v3699_v38 = vld [vmem:[#allocation6 + $0x52c] sm:$0xf] }
  0xad   :  { %v4013_v14 = vpack.c.bf16 %v298_v5, %v298_v5  ;;  %v4015_v15 = vpack.c.bf16 %v299_v6, %v299_v6  ;;  %v2888_v6 = vor.u32 %v3624_v57, %v2885_v58  ;;  %v2748_v13 = vor.u32 %v3589_v63, %v2745_v1  ;;  %v3165_v57 = vld [vmem:[#allocation6 + $0x514] sm:$0xf0]  ;;  %v2991_v58 = vld [vmem:[#allocation6 + $0x3a0] sm:$0xf] }
  0xae   :  { %v2831_v63 = vld [vmem:[#allocation6 + $0x260] sm:$0xf] }
  0xaf   :  { %1959 = vmatmul.bf16.vlgmr.msra.gmra.mxu1 %v4013_v14  ;;  %1972 = vmatmul.bf16.vlgmr.msra.gmra.mxu2 %v4015_v15 }
  0xb0   :  { %2029 = vmatpush.bf16.msra.mxu1 %v2828_v7  ;;  %2068 = vmatpush.bf16.msra.mxu2 %v3308_v8  ;;  %v242_v23 = vpop.f32.mrf.mxu2  ;;  %v255_v24 = vpop.f32.mrf.mxu3  ;;  %v3048_v7 = vor.u32 %v3664_v59, %v3045_v60  ;;  %v3619_v8 = vld [vmem:[#allocation6 + $0x2ac] sm:$0xf]  ;;  %v3652_v59 = vld [vmem:[#allocation6 + $0x3b0] sm:$0xf0]  ;;  %v3769_v60 = vld [vmem:[#allocation6 + $0x75c] sm:$0xf] }
  0xb1   :  { %2044 = vmatpush.bf16.msrb.mxu3 %v2948_v9  ;;  %2057 = vmatpush.bf16.msra.mxu0 %v3108_v16  ;;  %v266_v29 = vpop.f32.mrf.mxu0  ;;  %v279_v31 = vpop.f32.mrf.mxu1  ;;  %v2865_v9 = vld [vmem:[#allocation6 + $0x2bc] sm:$0xf0]  ;;  %v3228_v16 = vor.u32 %v3709_v2, %v3225_v3  ;;  %v3614_v24 = vld [vmem:[#allocation6 + $0x284] sm:$0xf]  ;;  %v2631_v3 = vld [vmem:[#allocation6 + $0xd0] sm:$0xf] }
  0xb2   :  { %v267_v36 = vadd.f32 %v266_v29, %v115_v10  ;;  %v280_v37 = vadd.f32 %v279_v31, %v116_v11  ;;  %v3659_v11 = vld [vmem:[#allocation6 + $0x3ec] sm:$0xf]  ;;  %v2868_v22 = vor.u32 %v3619_v8, %v2865_v9  ;;  %v3505_v29 = vld [vmem:[#allocation6 + $0x7bc] sm:$0xf0]  ;;  %v2728_v31 = vor.u32 %v3584_v17, %v2725_v19  ;;  %v2611_v17 = vld [vmem:[#allocation6 + $0xa8] sm:$0xf] }
  0xb3   :  { %v3028_v23 = vor.u32 %v3659_v11, %v3025_v12  ;;  %v3508_v43 = vor.u32 %v3779_v28, %v3505_v29  ;;  %v3647_v9 = vld [vmem:[#allocation6 + $0x388] sm:$0xf0]  ;;  %v3445_v11 = vld [vmem:[#allocation6 + $0x744] sm:$0xf0]  ;;  %v3557_v19 = vld [vmem:[#allocation6 + $0xb8] sm:$0xf0] }
  0xb4   :  { %v300_v44 = vmax.f32 %v267_v36, 0.0  ;;  %v301_v45 = vmax.f32 %v280_v37, 0.0  ;;  %2030 = vmatpush.bf16.msra.mxu1 %v2808_v25  ;;  %2069 = vmatpush.bf16.msra.mxu2 %v3288_v26  ;;  %v2845_v25 = vld [vmem:[#allocation6 + $0x294] sm:$0xf0]  ;;  %v3654_v26 = vld [vmem:[#allocation6 + $0x3c4] sm:$0xf] }
  0xb5   :  { %2045 = vmatpush.bf16.msrb.mxu3 %v2928_v32  ;;  %2058 = vmatpush.bf16.msra.mxu0 %v3088_v33  ;;  %v3208_v32 = vor.u32 %v3704_v20, %v3205_v21  ;;  %v3579_v36 = vld [vmem:[#allocation6 + $0x16c] sm:$0xf]  ;;  %v2705_v37 = vld [vmem:[#allocation6 + $0x17c] sm:$0xf0]  ;;  %v2848_v41 = vor.u32 %v3614_v24, %v2845_v25  ;;  %v3008_v42 = vor.u32 %v3654_v26, %v3005_v27  ;;  %v3642_v24 = vld [vmem:[#allocation6 + $0x360] sm:$0xf0] }
  0xb6   :  { %v4020_v53 = vpack.c.bf16 %v300_v44, %v300_v44  ;;  %v4022_v54 = vpack.c.bf16 %v301_v45, %v301_v45  ;;  %v2672_v44 = vor.u32 %v3572_v35, %v2671_v34  ;;  %v3774_v45 = vld [vmem:[#allocation6 + $0x784] sm:$0xf]  ;;  %v2708_v48 = vor.u32 %v3579_v36, %v2705_v37  ;;  %v3759_v25 = vld [vmem:[#allocation6 + $0x70c] sm:$0xf]  ;;  %v3425_v26 = vld [vmem:[#allocation6 + $0x71c] sm:$0xf0] }
  0xb7   :  { %v2612_v27 = vor.u32 %v3557_v19, %v2611_v17  ;;  %v2791_v28 = vld [vmem:[#allocation6 + $0x210] sm:$0xf]  ;;  %v3602_v29 = vld [vmem:[#allocation6 + $0x220] sm:$0xf0]  ;;  %v3428_v34 = vor.u32 %v3759_v25, %v3425_v26  ;;  %v2931_v35 = vld [vmem:[#allocation6 + $0x328] sm:$0xf] }
  0xb8   :  { %2031 = vmatpush.bf16.msra.mxu1 %v2788_v40  ;;  %2070 = vmatpush.bf16.msra.mxu2 %v3268_v46  ;;  %v292_v61 = vpop.f32.mrf.mxu2  ;;  %v3185_v40 = vld [vmem:[#allocation6 + $0x53c] sm:$0xf0]  ;;  %v3485_v46 = vld [vmem:[#allocation6 + $0x794] sm:$0xf0]  ;;  %v2792_v36 = vor.u32 %v3602_v29, %v2791_v28  ;;  %v3637_v37 = vld [vmem:[#allocation6 + $0x338] sm:$0xf0] }
  0xb9   :  { %v293_v0 = vadd.f32 %v292_v61, %v117_v47  ;;  %1985 = vmatmul.bf16.vlgmr.msra.gmra.mxu3 %v4020_v53  ;;  %1998 = vmatmul.bf16.vlgmr.msrb.gmra.mxu0 %v4022_v54  ;;  %v281_v4 = vpop.f32.mrf.mxu1  ;;  %v268_v5 = vpop.f32.mrf.mxu0  ;;  %v2651_v47 = vld [vmem:[#allocation6 + $0xf8] sm:$0xf]  ;;  %v3188_v49 = vor.u32 %v3699_v38, %v3185_v40  ;;  %v3465_v61 = vld [vmem:[#allocation6 + $0x76c] sm:$0xf0]  ;;  %v3754_v38 = vld [vmem:[#allocation6 + $0x6e4] sm:$0xf] }
  0xba   :  { %2046 = vmatpush.bf16.msrb.mxu3 %v2908_v55  ;;  %2059 = vmatpush.bf16.msra.mxu0 %v3068_v56  ;;  %v2685_v55 = vld [vmem:[#allocation6 + $0x154] sm:$0xf0]  ;;  %v3694_v56 = vld [vmem:[#allocation6 + $0x504] sm:$0xf]  ;;  %v2992_v5 = vor.u32 %v3652_v59, %v2991_v58  ;;  %v3592_v58 = vld [vmem:[#allocation6 + $0x1d0] sm:$0xf0] }
  0xbb   :  { %v302_v10 = vmax.f32 %v293_v0, 0.0  ;;  %v3612_v0 = vld [vmem:[#allocation6 + $0x270] sm:$0xf0]  ;;  %v2688_v1 = vor.u32 %v3574_v52, %v2685_v55  ;;  %v3168_v2 = vor.u32 %v3694_v56, %v3165_v57  ;;  %v3562_v4 = vld [vmem:[#allocation6 + $0xe0] sm:$0xf0] }
  0xbc   :  { %2032 = vmatpush.bf16.msra.mxu1 %v2768_v30  ;;  %2071 = vmatpush.bf16.msra.mxu2 %v3248_v62  ;;  %v3488_v30 = vor.u32 %v3774_v45, %v3485_v46  ;;  %v2652_v62 = vor.u32 %v3567_v51, %v2651_v47  ;;  %v2832_v8 = vor.u32 %v3612_v0, %v2831_v63  ;;  %v3405_v40 = vld [vmem:[#allocation6 + $0x6f4] sm:$0xf0]  ;;  %v3547_v45 = vld [vmem:[#allocation6 + $0x68] sm:$0xf0]  ;;  %v3632_v51 = vld [vmem:[#allocation6 + $0x310] sm:$0xf0] }
  0xbd   :  { %v4026_v18 = vpack.c.bf16 %v302_v10, %v302_v10  ;;  %v3764_v10 = vld [vmem:[#allocation6 + $0x734] sm:$0xf]  ;;  %v2632_v12 = vor.u32 %v3562_v4, %v2631_v3  ;;  %v2932_v46 = vor.u32 %v3637_v37, %v2931_v35  ;;  %v3408_v47 = vor.u32 %v3754_v38, %v3405_v40  ;;  %v3749_v52 = vld [vmem:[#allocation6 + $0x6bc] sm:$0xf]  ;;  %v3385_v55 = vld [vmem:[#allocation6 + $0x6cc] sm:$0xf0] }
  0xbe   :  { %2047 = vmatpush.bf16.msrb.mxu3 %v2888_v6  ;;  %2060 = vmatpush.bf16.msra.mxu0 %v3048_v7  ;;  %v3468_v6 = vor.u32 %v3769_v60, %v3465_v61  ;;  %v2971_v7 = vld [vmem:[#allocation6 + $0x378] sm:$0xf]  ;;  %v3448_v21 = vor.u32 %v3764_v10, %v3445_v11  ;;  %v2751_v57 = vld [vmem:[#allocation6 + $0x1c0] sm:$0xf]  ;;  %v2551_v59 = vld [vmem:[#allocation6 + $0x30] sm:$0xf] }
  0xbf   :  { %3521 = vmatmul.msk.bf16.vlgmr.msrb.gmra.mxu1 %vm1921_vm2, %v4026_v18  ;;  %2024 = vmatmul.bf16.vlgmr.msrb.gmra.mxu2 %v4005_v50  ;;  %v2972_v20 = vor.u32 %v3647_v9, %v2971_v7  ;;  %v3542_v60 = vld [vmem:[#allocation6 + $0x40] sm:$0xf0]  ;;  %v2752_v63 = vor.u32 %v3592_v58, %v2751_v57  ;;  %v3627_v0 = vld [vmem:[#allocation6 + $0x2e8] sm:$0xf0]  ;;  %v2731_v4 = vld [vmem:[#allocation6 + $0x198] sm:$0xf] }
  0xc0   :  { %2033 = vmatpush.bf16.msra.mxu1 %v2748_v13  ;;  %2072 = vmatpush.bf16.msra.mxu2 %v3228_v16  ;;  %v294_v33 = vpop.f32.mrf.mxu2  ;;  %v2811_v13 = vld [vmem:[#allocation6 + $0x238] sm:$0xf]  ;;  %v3607_v16 = vld [vmem:[#allocation6 + $0x248] sm:$0xf0]  ;;  %v2552_v3 = vor.u32 %v3542_v60, %v2551_v59  ;;  %v3537_v7 = vld [vmem:[#allocation6 + $0x18] sm:$0xf0] }
  0xc1   :  { %v2871_v10 = vld [vmem:[#allocation6 + $0x2b0] sm:$0xf]  ;;  %v3311_v11 = vld [vmem:[#allocation6 + $0x620] sm:$0xf]  ;;  %v3739_v17 = vld [vmem:[#allocation6 + $0x66c] sm:$0xf] }
  0xc2   :  { %2048 = vmatpush.bf16.msrb.mxu3 %v2868_v22  ;;  %2061 = vmatpush.bf16.msra.mxu0 %v3028_v23  ;;  %v2951_v22 = vld [vmem:[#allocation6 + $0x350] sm:$0xf]  ;;  %v2812_v23 = vor.u32 %v3607_v16, %v2811_v13  ;;  %v3622_v16 = vld [vmem:[#allocation6 + $0x2c0] sm:$0xf0]  ;;  %v3345_v19 = vld [vmem:[#allocation6 + $0x67c] sm:$0xf0] }
  0xc3   :  { %v2952_v33 = vor.u32 %v3642_v24, %v2951_v22  ;;  %v3582_v22 = vld [vmem:[#allocation6 + $0x180] sm:$0xf0]  ;;  %v2851_v24 = vld [vmem:[#allocation6 + $0x288] sm:$0xf]  ;;  %v3617_v25 = vld [vmem:[#allocation6 + $0x298] sm:$0xf0]  ;;  %v2872_v26 = vor.u32 %v3622_v16, %v2871_v10 }
  0xc4   :  { %2034 = vmatpush.bf16.msra.mxu1 %v2728_v31  ;;  %2073 = vmatpush.bf16.msra.mxu2 %v3208_v32  ;;  %v2591_v31 = vld [vmem:[#allocation6 + $0x80] sm:$0xf]  ;;  %v3552_v32 = vld [vmem:[#allocation6 + $0x90] sm:$0xf0]  ;;  %v3291_v28 = vld [vmem:[#allocation6 + $0x5f8] sm:$0xf] }
  0xc5   :  { %v3727_v29 = vld [vmem:[#allocation6 + $0x608] sm:$0xf0]  ;;  %v3577_v35 = vld [vmem:[#allocation6 + $0x158] sm:$0xf0]  ;;  %v3782_v37 = vld [vmem:[#allocation6 + $0x7c0] sm:$0xf0] }
  0xc6   :  { %2049 = vmatpush.bf16.msrb.mxu3 %v2848_v41  ;;  %2062 = vmatpush.bf16.msra.mxu0 %v3008_v42  ;;  %v2592_v41 = vor.u32 %v3552_v32, %v2591_v31  ;;  %v2771_v42 = vld [vmem:[#allocation6 + $0x1e8] sm:$0xf]  ;;  %v3734_v31 = vld [vmem:[#allocation6 + $0x644] sm:$0xf]  ;;  %v3151_v38 = vld [vmem:[#allocation6 + $0x4e0] sm:$0xf]  ;;  %v3292_v40 = vor.u32 %v3727_v29, %v3291_v28 }
  0xc7   :  { %v3131_v57 = vld [vmem:[#allocation6 + $0x4b8] sm:$0xf]  ;;  %v3687_v58 = vld [vmem:[#allocation6 + $0x4c8] sm:$0xf0]  ;;  %v3605_v10 = vld [vmem:[#allocation6 + $0x23c] sm:$0xf] }
  0xc8   :  { %2035 = vmatpush.bf16.msra.mxu1 %v2708_v48  ;;  %2074 = vmatpush.bf16.msra.mxu2 %v3188_v49  ;;  %v2911_v48 = vld [vmem:[#allocation6 + $0x300] sm:$0xf]  ;;  %v3451_v59 = vld [vmem:[#allocation6 + $0x738] sm:$0xf]  ;;  %v3767_v60 = vld [vmem:[#allocation6 + $0x748] sm:$0xf0] }
  0xc9   :  { %2050 = vmatmul.bf16.vlgmr.msrb.gmra.mxu3 %v4013_v14  ;;  %2063 = vmatmul.bf16.vlgmr.msra.gmra.mxu0 %v4015_v15  ;;  %v2912_v61 = vor.u32 %v3632_v51, %v2911_v48  ;;  %v3271_v48 = vld [vmem:[#allocation6 + $0x5d0] sm:$0xf]  ;;  %v3707_v28 = vld [vmem:[#allocation6 + $0x568] sm:$0xf0] }
  0xca   :  { %2100 = vmatpush.bf16.msra.mxu3 %v3508_v43  ;;  %2107 = vmatpush.bf16.msrb.mxu0 %v2672_v44  ;;  %v3597_v43 = vld [vmem:[#allocation6 + $0x1f8] sm:$0xf0]  ;;  %v2571_v44 = vld [vmem:[#allocation6 + $0x58] sm:$0xf] }
  0xcb   :  { %v2772_v49 = vor.u32 %v3597_v43, %v2771_v42  ;;  %v2572_v56 = vor.u32 %v3547_v45, %v2571_v44  ;;  %v3471_v42 = vld [vmem:[#allocation6 + $0x760] sm:$0xf]  ;;  %v3772_v43 = vld [vmem:[#allocation6 + $0x770] sm:$0xf0]  ;;  %v2852_v44 = vor.u32 %v3617_v25, %v2851_v24 }
  0xcc   :  { %2036 = vmatpush.bf16.msra.mxu1 %v2688_v1  ;;  %2075 = vmatpush.bf16.msra.mxu2 %v3168_v2  ;;  %v3744_v1 = vld [vmem:[#allocation6 + $0x694] sm:$0xf]  ;;  %v3365_v2 = vld [vmem:[#allocation6 + $0x6a4] sm:$0xf0] }
  0xcd   :  { %v3368_v9 = vor.u32 %v3744_v1, %v3365_v2  ;;  %v3717_v1 = vld [vmem:[#allocation6 + $0x5b8] sm:$0xf0]  ;;  %v3132_v2 = vor.u32 %v3687_v58, %v3131_v57  ;;  %v3600_v25 = vld [vmem:[#allocation6 + $0x214] sm:$0xf] }
  0xce   :  { %2101 = vmatpush.bf16.msra.mxu3 %v3488_v30  ;;  %2108 = vmatpush.bf16.msrb.mxu0 %v2652_v62  ;;  %v3388_v30 = vor.u32 %v3749_v52, %v3385_v55  ;;  %v2891_v62 = vld [vmem:[#allocation6 + $0x2d8] sm:$0xf]  ;;  %v3472_v52 = vor.u32 %v3772_v43, %v3471_v42  ;;  %v3491_v55 = vld [vmem:[#allocation6 + $0x788] sm:$0xf]  ;;  %v3702_v42 = vld [vmem:[#allocation6 + $0x540] sm:$0xf0] }
  0xcf   :  { %2037 = vmatmul.bf16.vlgmr.msra.gmra.mxu1 %v4007_v39  ;;  %2076 = vmatmul.bf16.vlgmr.msra.gmra.mxu2 %v4020_v53  ;;  %v3697_v57 = vld [vmem:[#allocation6 + $0x518] sm:$0xf0] }
  0xd0   :  { %2081 = vmatpush.bf16.msrb.mxu1 %v3468_v6  ;;  %2120 = vmatpush.bf16.msrb.mxu2 %v2832_v8  ;;  %v2531_v6 = vld [vmem:[#allocation6 + $0x8] sm:$0xf]  ;;  %v2892_v8 = vor.u32 %v3627_v0, %v2891_v62  ;;  %v2833_v62 = vld [vmem:[#allocation6 + $0x274] sm:$0xf0] }
  0xd1   :  { %v3251_v0 = vld [vmem:[#allocation6 + $0x5a8] sm:$0xf] }
  0xd2   :  { %2133 = vmatpush.bf16.msrb.mxu3 %v2992_v5  ;;  %2109 = vmatpush.bf16.msrb.mxu0 %v2632_v12  ;;  %v3587_v5 = vld [vmem:[#allocation6 + $0x1a8] sm:$0xf0]  ;;  %v3732_v12 = vld [vmem:[#allocation6 + $0x630] sm:$0xf0] }
  0xd3   :  { %v2732_v13 = vor.u32 %v3587_v5, %v2731_v4  ;;  %v3111_v4 = vld [vmem:[#allocation6 + $0x490] sm:$0xf] }
  0xd4   :  { %2082 = vmatpush.bf16.msrb.mxu1 %v3448_v21  ;;  %2121 = vmatpush.bf16.msrb.mxu2 %v2812_v23  ;;  %v2711_v21 = vld [vmem:[#allocation6 + $0x170] sm:$0xf]  ;;  %v3312_v23 = vor.u32 %v3732_v12, %v3311_v11  ;;  %v3231_v12 = vld [vmem:[#allocation6 + $0x580] sm:$0xf] }
  0xd5   :  { %v2712_v32 = vor.u32 %v3582_v22, %v2711_v21  ;;  %v2813_v11 = vld [vmem:[#allocation6 + $0x24c] sm:$0xf0]  ;;  %v3677_v21 = vld [vmem:[#allocation6 + $0x478] sm:$0xf0]  ;;  %v3411_v22 = vld [vmem:[#allocation6 + $0x6e8] sm:$0xf] }
  0xd6   :  { %2134 = vmatpush.bf16.msrb.mxu3 %v2972_v20  ;;  %2110 = vmatpush.bf16.msrb.mxu0 %v2612_v27  ;;  %v2532_v20 = vor.u32 %v3537_v7, %v2531_v6  ;;  %v3348_v27 = vor.u32 %v3739_v17, %v3345_v19  ;;  %v3682_v6 = vld [vmem:[#allocation6 + $0x4a0] sm:$0xf0]  ;;  %v3431_v7 = vld [vmem:[#allocation6 + $0x710] sm:$0xf]  ;;  %v3091_v19 = vld [vmem:[#allocation6 + $0x468] sm:$0xf] }
  0xd7   :  { %v3112_v16 = vor.u32 %v3682_v6, %v3111_v4  ;;  %v3092_v29 = vor.u32 %v3677_v21, %v3091_v19  ;;  %v2733_v4 = vld [vmem:[#allocation6 + $0x1ac] sm:$0xf0]  ;;  %v3645_v6 = vld [vmem:[#allocation6 + $0x37c] sm:$0xf]  ;;  %v2713_v19 = vld [vmem:[#allocation6 + $0x184] sm:$0xf0] }
  0xd8   :  { %2083 = vmatpush.bf16.msrb.mxu1 %v3428_v34  ;;  %2122 = vmatpush.bf16.msrb.mxu2 %v2792_v36  ;;  %v2691_v34 = vld [vmem:[#allocation6 + $0x148] sm:$0xf]  ;;  %v3511_v36 = vld [vmem:[#allocation6 + $0x7b0] sm:$0xf]  ;;  %v2673_v21 = vld [vmem:[#allocation6 + $0x134] sm:$0xf0] }
  0xd9   :  { %3522 = vmatmul.msk.bf16.vlgmr.msra.gmra.mxu3 %vm1921_vm2, %v4026_v18 }
  0xda   :  { %2135 = vmatpush.bf16.msrb.mxu3 %v2952_v33  ;;  %2111 = vmatpush.bf16.msrb.mxu0 %v2592_v41  ;;  %v3325_v33 = vld [vmem:[#allocation6 + $0x654] sm:$0xf0]  ;;  %v3692_v41 = vld [vmem:[#allocation6 + $0x4f0] sm:$0xf0] }
  0xdb   :  { %v3328_v45 = vor.u32 %v3734_v31, %v3325_v33  ;;  %v3152_v51 = vor.u32 %v3692_v41, %v3151_v38  ;;  %v3595_v38 = vld [vmem:[#allocation6 + $0x1ec] sm:$0xf]  ;;  %v3191_v41 = vld [vmem:[#allocation6 + $0x530] sm:$0xf] }
  0xdc   :  { %2084 = vmatpush.bf16.msrb.mxu1 %v3408_v47  ;;  %2123 = vmatpush.bf16.msrb.mxu2 %v2772_v49  ;;  %v3512_v47 = vor.u32 %v3782_v37, %v3511_v36  ;;  %v3722_v49 = vld [vmem:[#allocation6 + $0x5e0] sm:$0xf0]  ;;  %v3752_v36 = vld [vmem:[#allocation6 + $0x6d0] sm:$0xf0] }
  0xde   :  { %2136 = vmatpush.bf16.msrb.mxu3 %v2932_v46  ;;  %2112 = vmatpush.bf16.msrb.mxu0 %v2572_v56  ;;  %v2692_v46 = vor.u32 %v3577_v35, %v2691_v34  ;;  %v3777_v56 = vld [vmem:[#allocation6 + $0x798] sm:$0xf0]  ;;  %v3672_v34 = vld [vmem:[#allocation6 + $0x450] sm:$0xf0]  ;;  %v3391_v35 = vld [vmem:[#allocation6 + $0x6c0] sm:$0xf] }
  0xe0   :  { %2085 = vmatpush.bf16.msrb.mxu1 %v3388_v30  ;;  %2124 = vmatpush.bf16.msrb.mxu2 %v2752_v63  ;;  %v3610_v30 = vld [vmem:[#allocation6 + $0x264] sm:$0xf]  ;;  %v3492_v63 = vor.u32 %v3777_v56, %v3491_v55  ;;  %v2753_v55 = vld [vmem:[#allocation6 + $0x1d4] sm:$0xf0]  ;;  %v3171_v56 = vld [vmem:[#allocation6 + $0x508] sm:$0xf] }
  0xe1   :  { %v2836_v5 = vor.u32 %v3610_v30, %v2833_v62  ;;  %v3031_v30 = vld [vmem:[#allocation6 + $0x3f0] sm:$0xf] }
  0xe2   :  { %2137 = vmatpush.bf16.msrb.mxu3 %v2912_v61  ;;  %2113 = vmatpush.bf16.msrb.mxu0 %v2552_v3  ;;  %v3272_v61 = vor.u32 %v3722_v49, %v3271_v48  ;;  %v3452_v3 = vor.u32 %v3767_v60, %v3451_v59  ;;  %v3371_v48 = vld [vmem:[#allocation6 + $0x698] sm:$0xf]  ;;  %v3747_v49 = vld [vmem:[#allocation6 + $0x6a8] sm:$0xf0]  ;;  %v3650_v60 = vld [vmem:[#allocation6 + $0x3a4] sm:$0xf] }
  0xe3   :  { %v3372_v59 = vor.u32 %v3747_v49, %v3371_v48  ;;  %v3560_v49 = vld [vmem:[#allocation6 + $0xd4] sm:$0xf] }
  0xe4   :  { %2086 = vmatpush.bf16.msrb.mxu1 %v3368_v9  ;;  %2125 = vmatpush.bf16.msrb.mxu2 %v2732_v13  ;;  %v3252_v9 = vor.u32 %v3717_v1, %v3251_v0  ;;  %v3712_v13 = vld [vmem:[#allocation6 + $0x590] sm:$0xf0]  ;;  %v3351_v0 = vld [vmem:[#allocation6 + $0x670] sm:$0xf]  ;;  %v3742_v1 = vld [vmem:[#allocation6 + $0x680] sm:$0xf0] }
  0xe5   :  { %v3232_v24 = vor.u32 %v3712_v13, %v3231_v12  ;;  %v3331_v13 = vld [vmem:[#allocation6 + $0x648] sm:$0xf] }
  0xe6   :  { %2138 = vmatpush.bf16.msrb.mxu3 %v2892_v8  ;;  %2114 = vmatpush.bf16.msrb.mxu0 %v2532_v20  ;;  %v3762_v8 = vld [vmem:[#allocation6 + $0x720] sm:$0xf0]  ;;  %v2816_v20 = vor.u32 %v3605_v10, %v2813_v11  ;;  %v3011_v10 = vld [vmem:[#allocation6 + $0x3c8] sm:$0xf]  ;;  %v3657_v11 = vld [vmem:[#allocation6 + $0x3d8] sm:$0xf0] }
  0xe7   :  { %v3432_v17 = vor.u32 %v3762_v8, %v3431_v7  ;;  %v3352_v8 = vor.u32 %v3742_v1, %v3351_v0  ;;  %v2613_v0 = vld [vmem:[#allocation6 + $0xbc] sm:$0xf0]  ;;  %v3675_v1 = vld [vmem:[#allocation6 + $0x46c] sm:$0xf] }
  0xe8   :  { %2087 = vmatpush.bf16.msrb.mxu1 %v3348_v27  ;;  %2126 = vmatpush.bf16.msrb.mxu2 %v2712_v32  ;;  %v3211_v27 = vld [vmem:[#allocation6 + $0x558] sm:$0xf]  ;;  %v3071_v32 = vld [vmem:[#allocation6 + $0x440] sm:$0xf] }
  0xe9   :  { %2115 = vmatmul.bf16.vlgmr.msrb.gmra.mxu0 %v4005_v50  ;;  %v3212_v37 = vor.u32 %v3707_v28, %v3211_v27  ;;  %v3072_v43 = vor.u32 %v3672_v34, %v3071_v32  ;;  %v3640_v27 = vld [vmem:[#allocation6 + $0x354] sm:$0xf]  ;;  %v3575_v32 = vld [vmem:[#allocation6 + $0x14c] sm:$0xf] }
  0xea   :  { %2159 = vmatpush.bf16.msra.mxu0 %v3312_v23  ;;  %2139 = vmatpush.bf16.msrb.mxu3 %v2872_v26  ;;  %v3757_v23 = vld [vmem:[#allocation6 + $0x6f8] sm:$0xf0]  ;;  %v2793_v26 = vld [vmem:[#allocation6 + $0x224] sm:$0xf0] }
  0xeb   :  { %v3412_v31 = vor.u32 %v3757_v23, %v3411_v22  ;;  %v2796_v33 = vor.u32 %v3600_v25, %v2793_v26  ;;  %v3690_v23 = vld [vmem:[#allocation6 + $0x4e4] sm:$0xf]  ;;  %v3012_v25 = vor.u32 %v3657_v11, %v3011_v10 }
  0xec   :  { %2088 = vmatpush.bf16.msrb.mxu1 %v3328_v45  ;;  %2127 = vmatpush.bf16.msrb.mxu2 %v2692_v46  ;;  %v3051_v45 = vld [vmem:[#allocation6 + $0x418] sm:$0xf]  ;;  %v3550_v11 = vld [vmem:[#allocation6 + $0x84] sm:$0xf] }
  0xee   :  { %2160 = vmatpush.bf16.msra.mxu0 %v3292_v40  ;;  %2140 = vmatpush.bf16.msrb.mxu3 %v2852_v44  ;;  %v2773_v40 = vld [vmem:[#allocation6 + $0x1fc] sm:$0xf0]  ;;  %v3392_v44 = vor.u32 %v3752_v36, %v3391_v35  ;;  %v3565_v35 = vld [vmem:[#allocation6 + $0xfc] sm:$0xf]  ;;  %v2653_v36 = vld [vmem:[#allocation6 + $0x10c] sm:$0xf0] }
  0xef   :  { %2089 = vmatmul.bf16.vlgmr.msrb.gmra.mxu1 %v4022_v54  ;;  %2128 = vmatmul.bf16.vlgmr.msrb.gmra.mxu2 %v4007_v39  ;;  %v2776_v46 = vor.u32 %v3595_v38, %v2773_v40  ;;  %v3133_v38 = vld [vmem:[#allocation6 + $0x4cc] sm:$0xf0]  ;;  %v3770_v40 = vld [vmem:[#allocation6 + $0x764] sm:$0xf] }
  0xf0   :  { %2146 = vmatpush.bf16.msra.mxu1 %v3152_v51  ;;  %2172 = vmatpush.bf16.msra.mxu2 %v3472_v52  ;;  %v3192_v51 = vor.u32 %v3702_v42, %v3191_v41  ;;  %v3590_v52 = vld [vmem:[#allocation6 + $0x1c4] sm:$0xf]  ;;  %v3473_v41 = vld [vmem:[#allocation6 + $0x774] sm:$0xf0] }
  0xf1   :  { %2141 = vmatmul.bf16.vlgmr.msrb.gmra.mxu3 %v4013_v14  ;;  %v2756_v62 = vor.u32 %v3590_v52, %v2753_v55  ;;  %v3476_v48 = vor.u32 %v3770_v40, %v3473_v41  ;;  %v3680_v52 = vld [vmem:[#allocation6 + $0x494] sm:$0xf]  ;;  %v3113_v55 = vld [vmem:[#allocation6 + $0x4a4] sm:$0xf0] }
  0xf2   :  { %2191 = vmatpush.bf16.msra.mxu3 %v3512_v47  ;;  %2161 = vmatpush.bf16.msra.mxu0 %v3272_v61  ;;  %v3667_v47 = vld [vmem:[#allocation6 + $0x428] sm:$0xf0]  ;;  %v2993_v61 = vld [vmem:[#allocation6 + $0x3b4] sm:$0xf0] }
  0xf3   :  { %v3052_v58 = vor.u32 %v3667_v47, %v3051_v45  ;;  %v3635_v45 = vld [vmem:[#allocation6 + $0x32c] sm:$0xf] }
  0xf4   :  { %2147 = vmatpush.bf16.msra.mxu1 %v3132_v2  ;;  %2173 = vmatpush.bf16.msra.mxu2 %v3452_v3  ;;  %v3172_v2 = vor.u32 %v3697_v57, %v3171_v56  ;;  %v3585_v3 = vld [vmem:[#allocation6 + $0x19c] sm:$0xf]  ;;  %v3453_v57 = vld [vmem:[#allocation6 + $0x74c] sm:$0xf0] }
  0xf5   :  { %v2736_v12 = vor.u32 %v3585_v3, %v2733_v4  ;;  %v3765_v56 = vld [vmem:[#allocation6 + $0x73c] sm:$0xf]  ;;  %v3760_v3 = vld [vmem:[#allocation6 + $0x714] sm:$0xf]  ;;  %v3433_v4 = vld [vmem:[#allocation6 + $0x724] sm:$0xf0] }
  0xf6   :  { %2192 = vmatpush.bf16.msra.mxu3 %v3492_v63  ;;  %2162 = vmatpush.bf16.msra.mxu0 %v3252_v9  ;;  %v3662_v63 = vld [vmem:[#allocation6 + $0x400] sm:$0xf0]  ;;  %v2973_v9 = vld [vmem:[#allocation6 + $0x38c] sm:$0xf0]  ;;  %v3436_v10 = vor.u32 %v3760_v3, %v3433_v4 }
  0xf7   :  { %v3032_v7 = vor.u32 %v3662_v63, %v3031_v30  ;;  %v2976_v22 = vor.u32 %v3645_v6, %v2973_v9  ;;  %v3116_v30 = vor.u32 %v3680_v52, %v3113_v55  ;;  %v3555_v63 = vld [vmem:[#allocation6 + $0xac] sm:$0xf]  ;;  %v3493_v55 = vld [vmem:[#allocation6 + $0x79c] sm:$0xf0] }
  0xf8   :  { %2148 = vmatpush.bf16.msra.mxu1 %v3112_v16  ;;  %2174 = vmatpush.bf16.msra.mxu2 %v3432_v17  ;;  %v3737_v16 = vld [vmem:[#allocation6 + $0x658] sm:$0xf0]  ;;  %v3580_v17 = vld [vmem:[#allocation6 + $0x174] sm:$0xf]  ;;  %v2616_v6 = vor.u32 %v3555_v63, %v2613_v0  ;;  %v3775_v52 = vld [vmem:[#allocation6 + $0x78c] sm:$0xf] }
  0xf9   :  { %v3332_v26 = vor.u32 %v3737_v16, %v3331_v13  ;;  %v2716_v28 = vor.u32 %v3580_v17, %v2713_v19  ;;  %v3670_v13 = vld [vmem:[#allocation6 + $0x444] sm:$0xf]  ;;  %v3073_v16 = vld [vmem:[#allocation6 + $0x454] sm:$0xf0]  ;;  %v3755_v17 = vld [vmem:[#allocation6 + $0x6ec] sm:$0xf]  ;;  %v3496_v3 = vor.u32 %v3775_v52, %v3493_v55 }
  0xfa   :  { %2211 = vmatpush.bf16.msrb.mxu3 %v2836_v5  ;;  %2163 = vmatpush.bf16.msra.mxu0 %v3232_v24  ;;  %v2996_v5 = vor.u32 %v3650_v60, %v2993_v61  ;;  %v3153_v24 = vld [vmem:[#allocation6 + $0x4f4] sm:$0xf0]  ;;  %v3630_v60 = vld [vmem:[#allocation6 + $0x304] sm:$0xf]  ;;  %v3413_v19 = vld [vmem:[#allocation6 + $0x6fc] sm:$0xf0] }
  0xfb   :  { %v3156_v34 = vor.u32 %v3690_v23, %v3153_v24  ;;  %v2913_v61 = vld [vmem:[#allocation6 + $0x314] sm:$0xf0]  ;;  %v2873_v23 = vld [vmem:[#allocation6 + $0x2c4] sm:$0xf0]  ;;  %v3076_v24 = vor.u32 %v3670_v13, %v3073_v16  ;;  %v3613_v0 = vld [vmem:[#allocation6 + $0x278] sm:$0xf0] }
  0xfc   :  { %2149 = vmatpush.bf16.msra.mxu1 %v3092_v29  ;;  %2175 = vmatpush.bf16.msra.mxu2 %v3412_v31  ;;  %v2953_v31 = vld [vmem:[#allocation6 + $0x364] sm:$0xf0]  ;;  %v2819_v13 = vld [vmem:[#allocation6 + $0x240] sm:$0xf]  ;;  %v3608_v16 = vld [vmem:[#allocation6 + $0x250] sm:$0xf0] }
  0xfd   :  { %v2956_v42 = vor.u32 %v3640_v27, %v2953_v31  ;;  %v2573_v27 = vld [vmem:[#allocation6 + $0x6c] sm:$0xf0]  ;;  %v3750_v31 = vld [vmem:[#allocation6 + $0x6c4] sm:$0xf]  ;;  %v2839_v63 = vld [vmem:[#allocation6 + $0x268] sm:$0xf] }
  0xfe   :  { %2212 = vmatpush.bf16.msrb.mxu3 %v2816_v20  ;;  %2164 = vmatpush.bf16.msra.mxu0 %v3212_v37  ;;  %v3570_v20 = vld [vmem:[#allocation6 + $0x124] sm:$0xf]  ;;  %v3685_v37 = vld [vmem:[#allocation6 + $0x4bc] sm:$0xf]  ;;  %v2619_v55 = vld [vmem:[#allocation6 + $0xb0] sm:$0xf] }
  0xff   :  { %v2676_v29 = vor.u32 %v3570_v20, %v2673_v21  ;;  %v3136_v47 = vor.u32 %v3685_v37, %v3133_v38  ;;  %v3780_v37 = vld [vmem:[#allocation6 + $0x7b4] sm:$0xf]  ;;  %v3513_v38 = vld [vmem:[#allocation6 + $0x7c4] sm:$0xf0] }
 0x100   :  { %2150 = vmatpush.bf16.msra.mxu1 %v3072_v43  ;;  %2176 = vmatpush.bf16.msra.mxu2 %v3392_v44  ;;  %v2656_v44 = vor.u32 %v3565_v35, %v2653_v36  ;;  %v2853_v36 = vld [vmem:[#allocation6 + $0x29c] sm:$0xf0] }
 0x101   :  { %3523 = vmatmul.msk.bf16.vlgmr.msra.gmra.mxu3 %vm1921_vm2, %v4026_v18 }
 0x102   :  { %2213 = vmatpush.bf16.msrb.mxu3 %v2796_v33  ;;  %2165 = vmatpush.bf16.msra.mxu0 %v3192_v51  ;;  %v2693_v33 = vld [vmem:[#allocation6 + $0x15c] sm:$0xf0]  ;;  %v2633_v51 = vld [vmem:[#allocation6 + $0xe4] sm:$0xf0] }
 0x103   :  { %v2696_v43 = vor.u32 %v3575_v32, %v2693_v33  ;;  %v3393_v32 = vld [vmem:[#allocation6 + $0x6d4] sm:$0xf0] }
 0x104   :  { %2151 = vmatpush.bf16.msra.mxu1 %v3052_v58  ;;  %2177 = vmatpush.bf16.msra.mxu2 %v3372_v59  ;;  %v2636_v59 = vor.u32 %v3560_v49, %v2633_v51  ;;  %v3396_v41 = vor.u32 %v3750_v31, %v3393_v32  ;;  %v3516_v49 = vor.u32 %v3780_v37, %v3513_v38  ;;  %v3603_v31 = vld [vmem:[#allocation6 + $0x228] sm:$0xf0]  ;;  %v3139_v38 = vld [vmem:[#allocation6 + $0x4c0] sm:$0xf] }
 0x105   :  { %v3563_v37 = vld [vmem:[#allocation6 + $0xe8] sm:$0xf0] }
 0x106   :  { %2214 = vmatpush.bf16.msrb.mxu3 %v2776_v46  ;;  %2166 = vmatpush.bf16.msra.mxu0 %v3172_v2  ;;  %v2933_v46 = vld [vmem:[#allocation6 + $0x33c] sm:$0xf0] }
 0x107   :  { %v2936_v58 = vor.u32 %v3635_v45, %v2933_v46  ;;  %v3093_v2 = vld [vmem:[#allocation6 + $0x47c] sm:$0xf0]  ;;  %v3033_v45 = vld [vmem:[#allocation6 + $0x404] sm:$0xf0]  ;;  %v3745_v46 = vld [vmem:[#allocation6 + $0x69c] sm:$0xf] }
 0x108   :  { %2152 = vmatpush.bf16.msra.mxu1 %v3032_v7  ;;  %2178 = vmatpush.bf16.msra.mxu2 %v3352_v8  ;;  %v3625_v7 = vld [vmem:[#allocation6 + $0x2dc] sm:$0xf]  ;;  %v2893_v8 = vld [vmem:[#allocation6 + $0x2ec] sm:$0xf0]  ;;  %v3096_v9 = vor.u32 %v3675_v1, %v3093_v2  ;;  %v3730_v1 = vld [vmem:[#allocation6 + $0x624] sm:$0xf] }
 0x109   :  { %2167 = vmatmul.bf16.vlgmr.msra.gmra.mxu0 %v4020_v53  ;;  %v2896_v20 = vor.u32 %v3625_v7, %v2893_v8  ;;  %v3313_v2 = vld [vmem:[#allocation6 + $0x634] sm:$0xf0] }
 0x10a   :  { %2215 = vmatpush.bf16.msrb.mxu3 %v2756_v62  ;;  %2224 = vmatpush.bf16.msrb.mxu0 %v2996_v5  ;;  %v3456_v62 = vor.u32 %v3765_v56, %v3453_v57  ;;  %v2916_v5 = vor.u32 %v3630_v60, %v2913_v61  ;;  %v3535_v56 = vld [vmem:[#allocation6 + $0xc] sm:$0xf]  ;;  %v3013_v61 = vld [vmem:[#allocation6 + $0x3dc] sm:$0xf0] }
 0x10b   :  { %v3655_v60 = vld [vmem:[#allocation6 + $0x3cc] sm:$0xf] }
 0x10c   :  { %2153 = vmatpush.bf16.msra.mxu1 %v3012_v25  ;;  %2179 = vmatpush.bf16.msra.mxu2 %v3332_v26  ;;  %v3416_v25 = vor.u32 %v3755_v17, %v3413_v19  ;;  %v3545_v26 = vld [vmem:[#allocation6 + $0x5c] sm:$0xf]  ;;  %v3016_v7 = vor.u32 %v3655_v60, %v3013_v61 }
 0x10d   :  { %v2576_v35 = vor.u32 %v3545_v26, %v2573_v27  ;;  %v3725_v19 = vld [vmem:[#allocation6 + $0x5fc] sm:$0xf]  ;;  %v2820_v27 = vor.u32 %v3608_v16, %v2819_v13  ;;  %v3588_v16 = vld [vmem:[#allocation6 + $0x1b0] sm:$0xf0] }
 0x10e   :  { %2216 = vmatpush.bf16.msrb.mxu3 %v2736_v12  ;;  %2225 = vmatpush.bf16.msrb.mxu0 %v2976_v22  ;;  %v2593_v12 = vld [vmem:[#allocation6 + $0x94] sm:$0xf0]  ;;  %v3620_v22 = vld [vmem:[#allocation6 + $0x2b4] sm:$0xf] }
 0x10f   :  { %2154 = vmatmul.bf16.vlgmr.msra.gmra.mxu1 %v4015_v15  ;;  %2180 = vmatmul.bf16.vlgmr.msra.gmra.mxu2 %v4022_v54  ;;  %v2596_v21 = vor.u32 %v3550_v11, %v2593_v12  ;;  %v2876_v33 = vor.u32 %v3620_v22, %v2873_v23  ;;  %v3316_v11 = vor.u32 %v3730_v1, %v3313_v2  ;;  %v3333_v12 = vld [vmem:[#allocation6 + $0x65c] sm:$0xf0]  ;;  %v3568_v22 = vld [vmem:[#allocation6 + $0x110] sm:$0xf0]  ;;  %v3159_v23 = vld [vmem:[#allocation6 + $0x4e8] sm:$0xf] }
 0x110   :  { %2198 = vmatpush.bf16.msrb.mxu1 %v2676_v29  ;;  %2237 = vmatpush.bf16.msrb.mxu2 %v3156_v34  ;;  %v3053_v29 = vld [vmem:[#allocation6 + $0x42c] sm:$0xf0]  ;;  %v3615_v34 = vld [vmem:[#allocation6 + $0x28c] sm:$0xf]  ;;  %v3233_v1 = vld [vmem:[#allocation6 + $0x594] sm:$0xf0] }
 0x112   :  { %2217 = vmatpush.bf16.msrb.mxu3 %v2716_v28  ;;  %2226 = vmatpush.bf16.msrb.mxu0 %v2956_v42  ;;  %v3665_v28 = vld [vmem:[#allocation6 + $0x41c] sm:$0xf]  ;;  %v3540_v42 = vld [vmem:[#allocation6 + $0x34] sm:$0xf] }
 0x113   :  { %v3056_v40 = vor.u32 %v3665_v28, %v3053_v29  ;;  %v2799_v29 = vld [vmem:[#allocation6 + $0x218] sm:$0xf] }
 0x114   :  { %2199 = vmatpush.bf16.msrb.mxu1 %v2656_v44  ;;  %2238 = vmatpush.bf16.msrb.mxu2 %v3136_v47  ;;  %v3660_v44 = vld [vmem:[#allocation6 + $0x3f4] sm:$0xf]  ;;  %v3373_v47 = vld [vmem:[#allocation6 + $0x6ac] sm:$0xf0] }
 0x115   :  { %v3036_v57 = vor.u32 %v3660_v44, %v3033_v45  ;;  %v3598_v44 = vld [vmem:[#allocation6 + $0x200] sm:$0xf0] }
 0x116   :  { %2218 = vmatpush.bf16.msrb.mxu3 %v2696_v43  ;;  %2227 = vmatpush.bf16.msrb.mxu0 %v2936_v58  ;;  %v2553_v43 = vld [vmem:[#allocation6 + $0x44] sm:$0xf0]  ;;  %v3376_v58 = vor.u32 %v3745_v46, %v3373_v47 }
 0x117   :  { %v2556_v51 = vor.u32 %v3540_v42, %v2553_v43  ;;  %v2779_v43 = vld [vmem:[#allocation6 + $0x1f0] sm:$0xf] }
 0x118   :  { %2200 = vmatpush.bf16.msrb.mxu1 %v2636_v59  ;;  %2239 = vmatpush.bf16.msrb.mxu2 %v3116_v30  ;;  %v2533_v59 = vld [vmem:[#allocation6 + $0x1c] sm:$0xf0]  ;;  %v3740_v30 = vld [vmem:[#allocation6 + $0x674] sm:$0xf]  ;;  %v2780_v60 = vor.u32 %v3598_v44, %v2779_v43 }
 0x119   :  { %2219 = vmatmul.bf16.vlgmr.msrb.gmra.mxu3 %v4007_v39  ;;  %v2536_v4 = vor.u32 %v3535_v56, %v2533_v59  ;;  %v3558_v56 = vld [vmem:[#allocation6 + $0xc0] sm:$0xf0]  ;;  %v3683_v59 = vld [vmem:[#allocation6 + $0x4a8] sm:$0xf0] }
 0x11a   :  { %2263 = vmatpush.bf16.msra.mxu3 %v3476_v48  ;;  %2228 = vmatpush.bf16.msrb.mxu0 %v2916_v5  ;;  %v2856_v48 = vor.u32 %v3615_v34, %v2853_v36  ;;  %v2679_v5 = vld [vmem:[#allocation6 + $0x128] sm:$0xf]  ;;  %v3720_v34 = vld [vmem:[#allocation6 + $0x5d4] sm:$0xf]  ;;  %v2639_v36 = vld [vmem:[#allocation6 + $0xd8] sm:$0xf] }
 0x11b   :  { %v2640_v45 = vor.u32 %v3563_v37, %v2639_v36  ;;  %v3193_v36 = vld [vmem:[#allocation6 + $0x544] sm:$0xf0] }
 0x11c   :  { %2201 = vmatpush.bf16.msrb.mxu1 %v2616_v6  ;;  %2240 = vmatpush.bf16.msrb.mxu2 %v3096_v9  ;;  %v3573_v6 = vld [vmem:[#allocation6 + $0x138] sm:$0xf0]  ;;  %v3735_v9 = vld [vmem:[#allocation6 + $0x64c] sm:$0xf] }
 0x11d   :  { %v2680_v17 = vor.u32 %v3573_v6, %v2679_v5  ;;  %v3336_v26 = vor.u32 %v3735_v9, %v3333_v12  ;;  %v3099_v5 = vld [vmem:[#allocation6 + $0x470] sm:$0xf]  ;;  %v3678_v6 = vld [vmem:[#allocation6 + $0x480] sm:$0xf0] }
 0x11e   :  { %2264 = vmatpush.bf16.msra.mxu3 %v3456_v62  ;;  %2229 = vmatpush.bf16.msrb.mxu0 %v2896_v20  ;;  %v3353_v62 = vld [vmem:[#allocation6 + $0x684] sm:$0xf0]  ;;  %v3293_v20 = vld [vmem:[#allocation6 + $0x60c] sm:$0xf0] }
 0x11f   :  { %v3356_v8 = vor.u32 %v3740_v30, %v3353_v62  ;;  %v3296_v28 = vor.u32 %v3725_v19, %v3293_v20  ;;  %v2759_v30 = vld [vmem:[#allocation6 + $0x1c8] sm:$0xf]  ;;  %v2620_v62 = vor.u32 %v3558_v56, %v2619_v55  ;;  %v3213_v19 = vld [vmem:[#allocation6 + $0x56c] sm:$0xf0]  ;;  %v3100_v20 = vor.u32 %v3678_v6, %v3099_v5  ;;  %v3173_v56 = vld [vmem:[#allocation6 + $0x51c] sm:$0xf0] }
 0x120   :  { %2202 = vmatpush.bf16.msrb.mxu1 %v2596_v21  ;;  %2241 = vmatpush.bf16.msrb.mxu2 %v3076_v24  ;;  %v2659_v21 = vld [vmem:[#allocation6 + $0x100] sm:$0xf]  ;;  %v3693_v24 = vld [vmem:[#allocation6 + $0x4f8] sm:$0xf0]  ;;  %v3319_v5 = vld [vmem:[#allocation6 + $0x628] sm:$0xf] }
 0x121   :  { %v2660_v32 = vor.u32 %v3568_v22, %v2659_v21  ;;  %v2579_v22 = vld [vmem:[#allocation6 + $0x60] sm:$0xf]  ;;  %v3733_v6 = vld [vmem:[#allocation6 + $0x638] sm:$0xf0] }
 0x122   :  { %2265 = vmatpush.bf16.msra.mxu3 %v3436_v10  ;;  %2230 = vmatpush.bf16.msrb.mxu0 %v2876_v33  ;;  %v2840_v10 = vor.u32 %v3613_v0, %v2839_v63  ;;  %v3160_v33 = vor.u32 %v3693_v24, %v3159_v23  ;;  %v3593_v63 = vld [vmem:[#allocation6 + $0x1d8] sm:$0xf0]  ;;  %v3710_v0 = vld [vmem:[#allocation6 + $0x584] sm:$0xf]  ;;  %v3548_v23 = vld [vmem:[#allocation6 + $0x70] sm:$0xf0] }
 0x123   :  { %v2760_v9 = vor.u32 %v3593_v63, %v2759_v30  ;;  %v3079_v24 = vld [vmem:[#allocation6 + $0x448] sm:$0xf]  ;;  %v3039_v30 = vld [vmem:[#allocation6 + $0x3f8] sm:$0xf]  ;;  %v3773_v63 = vld [vmem:[#allocation6 + $0x778] sm:$0xf0] }
 0x124   :  { %2203 = vmatpush.bf16.msrb.mxu1 %v2576_v35  ;;  %2242 = vmatpush.bf16.msrb.mxu2 %v3056_v40  ;;  %v3273_v35 = vld [vmem:[#allocation6 + $0x5e4] sm:$0xf0]  ;;  %v3688_v40 = vld [vmem:[#allocation6 + $0x4d0] sm:$0xf0] }
 0x125   :  { %v3276_v42 = vor.u32 %v3720_v34, %v3273_v35  ;;  %v3140_v46 = vor.u32 %v3688_v40, %v3139_v38  ;;  %v3583_v34 = vld [vmem:[#allocation6 + $0x188] sm:$0xf0]  ;;  %v3700_v35 = vld [vmem:[#allocation6 + $0x534] sm:$0xf]  ;;  %v2559_v38 = vld [vmem:[#allocation6 + $0x38] sm:$0xf] }
 0x126   :  { %2266 = vmatpush.bf16.msra.mxu3 %v3416_v25  ;;  %2231 = vmatpush.bf16.msrb.mxu0 %v2856_v48  ;;  %v4048_v25 = vpop.f32.mrf.mxu0  ;;  %v3715_v48 = vld [vmem:[#allocation6 + $0x5ac] sm:$0xf] }
 0x127   :  { %v3543_v40 = vld [vmem:[#allocation6 + $0x48] sm:$0xf0] }
 0x128   :  { %2204 = vmatpush.bf16.msrb.mxu1 %v2556_v51  ;;  %2243 = vmatpush.bf16.msrb.mxu2 %v3036_v57  ;;  %v2390_v51 = vld [vmem:[#allocation7] sm:$0x1f]  ;;  %v2560_v55 = vor.u32 %v3543_v40, %v2559_v38  ;;  %v2959_v38 = vld [vmem:[#allocation6 + $0x358] sm:$0xf]  ;;  %v3643_v40 = vld [vmem:[#allocation6 + $0x368] sm:$0xf0] }
 0x129   :  { %2232 = vmatmul.bf16.vlgmr.msrb.gmra.mxu0 %v4013_v14  ;;  %2395 = vst [vmem:[#allocation1] ss:$9 sm:$0xff] %v2390_v51 }
 0x12a   :  { %2267 = vmatpush.bf16.msra.mxu3 %v3396_v41  ;;  %2282 = vmatpush.bf16.msra.mxu0 %v3516_v49  ;;  %v2800_v41 = vor.u32 %v3603_v31, %v2799_v29  ;;  %v4052_v47 = vpop.f32.mrf.mxu3  ;;  %v3253_v49 = vld [vmem:[#allocation6 + $0x5bc] sm:$0xf0] }
 0x12b   :  { %v3256_v61 = vor.u32 %v3715_v48, %v3253_v49  ;;  %v3578_v48 = vld [vmem:[#allocation6 + $0x160] sm:$0xf0]  ;;  %v3695_v49 = vld [vmem:[#allocation6 + $0x50c] sm:$0xf] }
 0x12c   :  { %2205 = vmatpush.bf16.msrb.mxu1 %v2536_v4  ;;  %2244 = vmatpush.bf16.msrb.mxu2 %v3016_v7  ;;  %v4055_v52 = vpop.f32.mrf.mxu1  ;;  %v3553_v4 = vld [vmem:[#allocation6 + $0x98] sm:$0xf0] }
 0x12d   :  { %v4057_v7 = vld [vmem:[#allocation9 + $0x7] sm:$0x1f] }
 0x12e   :  { %2268 = vmatpush.bf16.msra.mxu3 %v3376_v58  ;;  %2283 = vmatpush.bf16.msra.mxu0 %v3496_v3  ;;  %v1949_v57 = vpop.f32.mrf.mxu0  ;;  %v3119_v58 = vld [vmem:[#allocation6 + $0x498] sm:$0xf]  ;;  %v2599_v3 = vld [vmem:[#allocation6 + $0x88] sm:$0xf] }
 0x12f   :  { %2206 = vmatmul.bf16.vlgmr.msrb.gmra.mxu1 %v4005_v50  ;;  %2245 = vmatmul.bf16.vlgmr.msrb.gmra.mxu2 %v4015_v15  ;;  %v3120_v2 = vor.u32 %v3683_v59, %v3119_v58  ;;  %v2600_v12 = vor.u32 %v3553_v4, %v2599_v3  ;;  %v2539_v57 = vld [vmem:[#allocation6 + $0x10] sm:$0xf]  ;;  %v3538_v58 = vld [vmem:[#allocation6 + $0x20] sm:$0xf0]  ;;  %v3176_v4 = vor.u32 %v3695_v49, %v3173_v56 }
 0x130   :  { %2250 = vmatpush.bf16.msra.mxu1 %v3316_v11  ;;  %2289 = vmatpush.bf16.msra.mxu2 %v2680_v17  ;;  %v2739_v11 = vld [vmem:[#allocation6 + $0x1a0] sm:$0xf]  ;;  %v3705_v17 = vld [vmem:[#allocation6 + $0x55c] sm:$0xf] }
 0x131   :  { %v2740_v29 = vor.u32 %v3588_v16, %v2739_v11  ;;  %v3216_v31 = vor.u32 %v3705_v17, %v3213_v19  ;;  %v3019_v16 = vld [vmem:[#allocation6 + $0x3d0] sm:$0xf]  ;;  %v3459_v17 = vld [vmem:[#allocation6 + $0x740] sm:$0xf]  ;;  %v3768_v19 = vld [vmem:[#allocation6 + $0x750] sm:$0xf0] }
 0x132   :  { %2269 = vmatpush.bf16.msra.mxu3 %v3356_v8  ;;  %2302 = vmatpush.bf16.msrb.mxu0 %v2840_v10  ;;  %v4059_v8 = vpop.f32.mrf.mxu2  ;;  %v3236_v10 = vor.u32 %v3710_v0, %v3233_v1  ;;  %v1936_v13 = vpop.f32.mrf.mxu3  ;;  %v3663_v0 = vld [vmem:[#allocation6 + $0x408] sm:$0xf0]  ;;  %v2999_v1 = vld [vmem:[#allocation6 + $0x3a8] sm:$0xf] }
 0x134   :  { %2251 = vmatpush.bf16.msra.mxu1 %v3296_v28  ;;  %2290 = vmatpush.bf16.msra.mxu2 %v2660_v32  ;;  %v1962_v21 = vpop.f32.mrf.mxu1  ;;  %v2719_v32 = vld [vmem:[#allocation6 + $0x178] sm:$0xf] }
 0x135   :  { %v2720_v44 = vor.u32 %v3583_v34, %v2719_v32  ;;  %v3658_v21 = vld [vmem:[#allocation6 + $0x3e0] sm:$0xf0] }
 0x136   :  { %2270 = vmatpush.bf16.msra.mxu3 %v3336_v26  ;;  %2303 = vmatpush.bf16.msrb.mxu0 %v2820_v27  ;;  %v3673_v26 = vld [vmem:[#allocation6 + $0x458] sm:$0xf0]  ;;  %v611_v27 = vperm.slane %v4057_v7, 0  ;;  %v4064_v28 = vpop.f32.mrf.mxu0 }
 0x137   :  { %v3080_v37 = vor.u32 %v3673_v26, %v3079_v24  ;;  %v3299_v26 = vld [vmem:[#allocation6 + $0x600] sm:$0xf] }
 0x138   :  { %2252 = vmatpush.bf16.msra.mxu1 %v3276_v42  ;;  %2291 = vmatpush.bf16.msra.mxu2 %v2640_v45  ;;  %v3668_v42 = vld [vmem:[#allocation6 + $0x430] sm:$0xf0]  ;;  %v3196_v45 = vor.u32 %v3700_v35, %v3193_v36  ;;  %v1935_v51 = vadd.f32 %v4052_v47, %v611_v27  ;;  %v3439_v35 = vld [vmem:[#allocation6 + $0x718] sm:$0xf]  ;;  %v3763_v36 = vld [vmem:[#allocation6 + $0x728] sm:$0xf0] }
 0x139   :  { %2271 = vmatmul.bf16.vlgmr.msra.gmra.mxu3 %v4022_v54  ;;  %3524 = vmatmul.msk.bf16.vlgmr.msra.gmra.mxu0 %vm1921_vm2, %v4026_v18  ;;  %v3728_v27 = vld [vmem:[#allocation6 + $0x610] sm:$0xf0] }
 0x13a   :  { %2328 = vmatpush.bf16.msrb.mxu3 %v3160_v33  ;;  %2304 = vmatpush.bf16.msrb.mxu0 %v2800_v41  ;;  %v2580_v33 = vor.u32 %v3548_v23, %v2579_v22  ;;  %v3059_v41 = vld [vmem:[#allocation6 + $0x420] sm:$0xf]  ;;  %v1975_v43 = vpop.f32.mrf.mxu2  ;;  %v3648_v23 = vld [vmem:[#allocation6 + $0x390] sm:$0xf0] }
 0x13b   :  { %v3060_v59 = vor.u32 %v3668_v42, %v3059_v41  ;;  %v2979_v22 = vld [vmem:[#allocation6 + $0x380] sm:$0xf]  ;;  %v3279_v41 = vld [vmem:[#allocation6 + $0x5d8] sm:$0xf]  ;;  %v3723_v42 = vld [vmem:[#allocation6 + $0x5e8] sm:$0xf0] }
 0x13c   :  { %2253 = vmatpush.bf16.msra.mxu1 %v3256_v61  ;;  %2292 = vmatpush.bf16.msra.mxu2 %v2620_v62  ;;  %v4069_v61 = vpop.f32.mrf.mxu1  ;;  %v3479_v62 = vld [vmem:[#allocation6 + $0x768] sm:$0xf]  ;;  %v2980_v34 = vor.u32 %v3648_v23, %v2979_v22  ;;  %v2396_v43 = vld [vmem:[#allocation1] sm:$0xff] }
 0x13d   :  { %v3480_v11 = vor.u32 %v3773_v63, %v3479_v62  ;;  %v3399_v63 = vld [vmem:[#allocation6 + $0x6c8] sm:$0xf] }
 0x13e   :  { %2329 = vmatpush.bf16.msrb.mxu3 %v3140_v46  ;;  %2305 = vmatpush.bf16.msrb.mxu0 %v2780_v60  ;;  %v2699_v46 = vld [vmem:[#allocation6 + $0x150] sm:$0xf]  ;;  %v4067_v60 = vpop.f32.mrf.mxu3  ;;  %v2001_v47 = vpop.f32.mrf.mxu0 }
 0x13f   :  { %v2700_v3 = vor.u32 %v3578_v48, %v2699_v46  ;;  %v2960_v46 = vor.u32 %v3643_v40, %v2959_v38  ;;  %v3758_v48 = vld [vmem:[#allocation6 + $0x700] sm:$0xf0]  ;;  %v3633_v47 = vld [vmem:[#allocation6 + $0x318] sm:$0xf0] }
 0x140   :  { %2254 = vmatpush.bf16.msra.mxu1 %v3236_v10  ;;  %2293 = vmatpush.bf16.msra.mxu2 %v2600_v12  ;;  %v2540_v10 = vor.u32 %v3538_v58, %v2539_v57  ;;  %v3040_v12 = vor.u32 %v3663_v0, %v3039_v30  ;;  %v3259_v57 = vld [vmem:[#allocation6 + $0x5b0] sm:$0xf]  ;;  %v3718_v58 = vld [vmem:[#allocation6 + $0x5c0] sm:$0xf0] }
 0x142   :  { %2330 = vmatpush.bf16.msrb.mxu3 %v3120_v2  ;;  %2306 = vmatpush.bf16.msrb.mxu0 %v2760_v9  ;;  %v3653_v2 = vld [vmem:[#allocation6 + $0x3b8] sm:$0xf0]  ;;  %v1948_v9 = vadd.f32 %v4048_v25, %v1935_v51  ;;  %v4072_v24 = vpop.f32.mrf.mxu2  ;;  %v3280_v51 = vor.u32 %v3723_v42, %v3279_v41  ;;  %v2859_v41 = vld [vmem:[#allocation6 + $0x290] sm:$0xf]  ;;  %v3618_v42 = vld [vmem:[#allocation6 + $0x2a0] sm:$0xf0] }
 0x143   :  { %v3000_v13 = vor.u32 %v3653_v2, %v2999_v1  ;;  %v3260_v1 = vor.u32 %v3718_v58, %v3259_v57  ;;  %v2919_v2 = vld [vmem:[#allocation6 + $0x308] sm:$0xf]  ;;  %v3778_v57 = vld [vmem:[#allocation6 + $0x7a0] sm:$0xf0]  ;;  %v612_v58 = vperm.slane %v4057_v7, 1 }
 0x144   :  { %2255 = vmatpush.bf16.msra.mxu1 %v3216_v31  ;;  %2294 = vmatpush.bf16.msra.mxu2 %v2580_v33  ;;  %v1961_v25 = vadd.f32 %v4055_v52, %v1948_v9  ;;  %v3020_v31 = vor.u32 %v3658_v21, %v3019_v16  ;;  %v2014_v33 = vpop.f32.mrf.mxu1  ;;  %v3379_v9 = vld [vmem:[#allocation6 + $0x6a0] sm:$0xf]  ;;  %v3628_v16 = vld [vmem:[#allocation6 + $0x2f0] sm:$0xf0] }
 0x145   :  { %v3703_v33 = vld [vmem:[#allocation6 + $0x548] sm:$0xf0] }
 0x146   :  { %2331 = vmatpush.bf16.msrb.mxu3 %v3100_v20  ;;  %2307 = vmatpush.bf16.msrb.mxu0 %v2740_v29  ;;  %v3320_v20 = vor.u32 %v3733_v6, %v3319_v5  ;;  %v3460_v29 = vor.u32 %v3768_v19, %v3459_v17  ;;  %v1988_v32 = vpop.f32.mrf.mxu3  ;;  %v4078_v52 = vpop.f32.mrf.mxu0  ;;  %v3713_v5 = vld [vmem:[#allocation6 + $0x598] sm:$0xf0]  ;;  %v2920_v6 = vor.u32 %v3633_v47, %v2919_v2  ;;  %v3708_v17 = vld [vmem:[#allocation6 + $0x570] sm:$0xf0] }
 0x147   :  { %v3199_v32 = vld [vmem:[#allocation6 + $0x538] sm:$0xf] }
 0x148   :  { %2256 = vmatpush.bf16.msra.mxu1 %v3196_v45  ;;  %2295 = vmatpush.bf16.msra.mxu2 %v2560_v55  ;;  %v3440_v45 = vor.u32 %v3763_v36, %v3439_v35  ;;  %v2939_v55 = vld [vmem:[#allocation6 + $0x330] sm:$0xf]  ;;  %v3200_v40 = vor.u32 %v3703_v33, %v3199_v32 }
 0x149   :  { %v3339_v36 = vld [vmem:[#allocation6 + $0x650] sm:$0xf] }
 0x14a   :  { %2332 = vmatpush.bf16.msrb.mxu3 %v3080_v37  ;;  %2308 = vmatpush.bf16.msrb.mxu0 %v2720_v44  ;;  %v3300_v37 = vor.u32 %v3728_v27, %v3299_v26  ;;  %v1974_v44 = vadd.f32 %v4059_v8, %v1961_v25  ;;  %v2027_v56 = vpop.f32.mrf.mxu2  ;;  %v3359_v26 = vld [vmem:[#allocation6 + $0x678] sm:$0xf]  ;;  %v3743_v27 = vld [vmem:[#allocation6 + $0x688] sm:$0xf0] }
 0x14b   :  { %v3499_v56 = vld [vmem:[#allocation6 + $0x790] sm:$0xf] }
 0x14c   :  { %2257 = vmatpush.bf16.msra.mxu1 %v3176_v4  ;;  %2296 = vmatpush.bf16.msra.mxu2 %v2540_v10  ;;  %v1987_v49 = vadd.f32 %v4067_v60, %v1974_v44  ;;  %v3753_v60 = vld [vmem:[#allocation6 + $0x6d8] sm:$0xf0]  ;;  %v3239_v4 = vld [vmem:[#allocation6 + $0x588] sm:$0xf]  ;;  %v3748_v10 = vld [vmem:[#allocation6 + $0x6b0] sm:$0xf0] }
 0x14d   :  { %v3698_v44 = vld [vmem:[#allocation6 + $0x520] sm:$0xf0] }
 0x14e   :  { %2333 = vmatpush.bf16.msrb.mxu3 %v3060_v59  ;;  %2309 = vmatpush.bf16.msrb.mxu0 %v2700_v3  ;;  %v4083_v59 = vpop.f32.mrf.mxu1  ;;  %v4085_v30 = vpop.f32.mrf.mxu3  ;;  %v2000_v0 = vadd.f32 %v4064_v28, %v1987_v49  ;;  %v3219_v28 = vld [vmem:[#allocation6 + $0x560] sm:$0xf]  ;;  %v2860_v49 = vor.u32 %v3618_v42, %v2859_v41  ;;  %v614_v42 = vperm.slane %v4057_v7, 3 }
 0x14f   :  { %2258 = vmatmul.bf16.vlgmr.msra.gmra.mxu1 %v4020_v53  ;;  %2297 = vmatmul.bf16.vlgmr.msra.gmra.mxu2 %v4005_v50  ;;  %v3638_v50 = vld [vmem:[#allocation6 + $0x340] sm:$0xf0]  ;;  %v2066_v3 = vpop.f32.mrf.mxu0 }
 0x150   :  { %2315 = vmatpush.bf16.msrb.mxu1 %v3000_v13  ;;  %2341 = vmatpush.bf16.msrb.mxu2 %v3320_v20  ;;  %v2940_v62 = vor.u32 %v3638_v50, %v2939_v55  ;;  %v2899_v13 = vld [vmem:[#allocation6 + $0x2e0] sm:$0xf]  ;;  %v3380_v20 = vor.u32 %v3748_v10, %v3379_v9  ;;  %v613_v10 = vperm.slane %v4057_v7, 2 }
 0x151   :  { %2310 = vmatmul.bf16.vlgmr.msrb.gmra.mxu0 %v4007_v39  ;;  %v3419_v39 = vld [vmem:[#allocation6 + $0x6f0] sm:$0xf]  ;;  %v2900_v23 = vor.u32 %v3628_v16, %v2899_v13 }
 0x152   :  { %2354 = vmatpush.bf16.msra.mxu0 %v3480_v11  ;;  %2334 = vmatpush.bf16.msrb.mxu3 %v3040_v12  ;;  %v3420_v8 = vor.u32 %v3758_v48, %v3419_v39  ;;  %v2013_v11 = vadd.f32 %v4069_v61, %v2000_v0  ;;  %v3240_v12 = vor.u32 %v3713_v5, %v3239_v4  ;;  %v4089_v19 = vpop.f32.mrf.mxu2  ;;  %v2879_v61 = vld [vmem:[#allocation6 + $0x2b8] sm:$0xf] }
 0x154   :  { %2316 = vmatpush.bf16.msrb.mxu1 %v2980_v34  ;;  %2342 = vmatpush.bf16.msrb.mxu2 %v3300_v37  ;;  %v2380_v25 = vmax.f32 %v2013_v11, 0.0  ;;  %v3360_v34 = vor.u32 %v3743_v27, %v3359_v26  ;;  %v3738_v37 = vld [vmem:[#allocation6 + $0x660] sm:$0xf0] }
 0x155   :  { %v3340_v48 = vor.u32 %v3738_v37, %v3339_v36  ;;  %v2399_v36 = vld [vmem:[#allocation1 + $0x1b] sm:$0xff] }
 0x156   :  { %2355 = vmatpush.bf16.msra.mxu0 %v3460_v29  ;;  %2335 = vmatpush.bf16.msrb.mxu3 %v3020_v31  ;;  %v2040_v21 = vpop.f32.mrf.mxu1  ;;  %v2053_v22 = vpop.f32.mrf.mxu3  ;;  %v3220_v29 = vor.u32 %v3708_v17, %v3219_v28  ;;  %v3623_v31 = vld [vmem:[#allocation6 + $0x2c8] sm:$0xf0]  ;;  %v2385_v38 = vpack.c.bf16 %v2380_v25, %v2380_v25 }
 0x157   :  { %v2880_v35 = vor.u32 %v3623_v31, %v2879_v61 }
 0x158   :  { %2317 = vmatpush.bf16.msrb.mxu1 %v2960_v46  ;;  %2343 = vmatpush.bf16.msrb.mxu2 %v3280_v51  ;;  %v3783_v46 = vld [vmem:[#allocation6 + $0x7c8] sm:$0xf0] }
 0x159   :  { %2336 = vmatmul.bf16.vlgmr.msrb.gmra.mxu3 %v4015_v15  ;;  %v3400_v15 = vor.u32 %v3753_v60, %v3399_v63  ;;  %v2397_v60 = vld [vmem:[#allocation1 + $0x9] sm:$0xff] }
 0x15a   :  { %2418 = vmatpush.bf16.xpose.msra.mxu3 %v2396_v43  ;;  %2356 = vmatpush.bf16.msra.mxu0 %v3440_v45  ;;  %v3179_v43 = vld [vmem:[#allocation6 + $0x510] sm:$0xf]  ;;  %v3519_v45 = vld [vmem:[#allocation6 + $0x7b8] sm:$0xf]  ;;  %v2079_v39 = vpop.f32.mrf.mxu2 }
 0x15b   :  { %v3180_v55 = vor.u32 %v3698_v44, %v3179_v43  ;;  %v3520_v50 = vor.u32 %v3783_v46, %v3519_v45 }
 0x15c   :  { %2318 = vmatpush.bf16.msrb.mxu1 %v2940_v62  ;;  %2344 = vmatpush.bf16.msrb.mxu2 %v3260_v1  ;;  %v2026_v62 = vadd.f32 %v4072_v24, %v612_v58  ;;  %v2400_v58 = vld [vmem:[#allocation1 + $0x24] sm:$0xff] }
 0x15e   :  { %2357 = vmatpush.bf16.msra.mxu0 %v3420_v8  ;;  %v2103_v51 = vpop.f32.mrf.mxu3  ;;  %v3500_v8 = vor.u32 %v3778_v57, %v3499_v56  ;;  %v2039_v1 = vadd.f32 %v4083_v59, %v2026_v62  ;;  %v2409_v62 = vsel %vm2405_vm3, %v2400_v58, 0 }
 0x160   :  { %2319 = vmatpush.bf16.msrb.mxu1 %v2920_v6  ;;  %2345 = vmatpush.bf16.msrb.mxu2 %v3240_v12  ;;  %v2052_v47 = vadd.f32 %v4085_v30, %v2039_v1 }
 0x162   :  { %2358 = vmatpush.bf16.msra.mxu0 %v3400_v15  ;;  %v2065_v4 = vadd.f32 %v4078_v52, %v2052_v47  ;;  %v2398_v15 = vld [vmem:[#allocation1 + $0x12] sm:$0xff]  ;;  %2457 = vmatpush.bf16.xpose.msrb.mxu3 %v2399_v36 }
 0x164   :  { %2320 = vmatpush.bf16.msrb.mxu1 %v2900_v23  ;;  %2346 = vmatpush.bf16.msrb.mxu2 %v3220_v29 }
 0x166   :  { %2359 = vmatpush.bf16.msra.mxu0 %v3380_v20  ;;  %v2116_v63 = vpop.f32.mrf.mxu0  ;;  %v2105_v0 = vpop.f32.mrf.mxu3 }
 0x167   :  { %v2117_v11 = vadd.f32 %v2116_v63, %v613_v10 }
 0x168   :  { %2321 = vmatpush.bf16.msrb.mxu1 %v2880_v35  ;;  %2347 = vmatpush.bf16.msrb.mxu2 %v3200_v40 }
 0x169   :  { %2419 = vmatmul.bf16.vlgmr.msra.gmra.mxu3 %v2385_v38 }
 0x16a   :  { %2360 = vmatpush.bf16.msra.mxu0 %v3360_v34 }
 0x16c   :  { %2322 = vmatpush.bf16.msrb.mxu1 %v2860_v49  ;;  %2348 = vmatpush.bf16.msrb.mxu2 %v3180_v55  ;;  %v2090_v2 = vpop.f32.mrf.mxu1 }
 0x16e   :  { %2361 = vmatpush.bf16.msra.mxu0 %v3340_v48  ;;  %v2118_v3 = vpop.f32.mrf.mxu0 }
 0x16f   :  { %2323 = vmatmul.bf16.vlgmr.msrb.gmra.mxu1 %v4013_v14  ;;  %2349 = vmatmul.bf16.vlgmr.msrb.gmra.mxu2 %v4020_v53  ;;  %v2078_v14 = vadd.f32 %v4089_v19, %v2065_v4  ;;  %v615_v4 = vperm.slane %v4057_v7, 4 }
 0x170   :  { %2373 = vmatpush.bf16.msra.mxu1 %v3520_v50  ;;  %2444 = vmatpush.bf16.xpose.msra.mxu2 %v2398_v15 }
 0x171   :  { %2362 = vmatmul.bf16.vlgmr.msra.gmra.mxu0 %v4022_v54  ;;  %v2091_v53 = vadd.f32 %v2090_v2, %v2078_v14 }
 0x172   :  { %v2129_v5 = vpop.f32.mrf.mxu2  ;;  %2470 = vmatpush.bf16.xpose.msrb.mxu0 %v2409_v62 }
 0x173   :  { %v2104_v59 = vadd.f32 %v2103_v51, %v2091_v53  ;;  %v2130_v16 = vadd.f32 %v2129_v5, %v2117_v11 }
 0x174   :  { %2374 = vmatpush.bf16.msra.mxu1 %v3500_v8  ;;  %v2142_v54 = vpop.f32.mrf.mxu3  ;;  %v2092_v24 = vpop.f32.mrf.mxu1 }
 0x175   :  { %v2381_v30 = vmax.f32 %v2104_v59, 0.0  ;;  %v2143_v28 = vadd.f32 %v2142_v54, %v2130_v16 }
 0x177   :  { %v2386_v52 = vpack.c.bf16 %v2381_v30, %v2381_v30 }
 0x178   :  { %2431 = vmatpush.bf16.xpose.msrb.mxu1 %v2397_v60 }
 0x17a   :  { %v2131_v9 = vpop.f32.mrf.mxu2 }
 0x17c   :  { %v2144_v6 = vpop.f32.mrf.mxu3 }
 0x17f   :  { %3525 = vmatmul.msk.bf16.vlgmr.msra.gmra.mxu1 %vm1921_vm2, %v4026_v18 }
 0x184   :  { %v2194_v12 = vpop.f32.mrf.mxu3 }
 0x186   :  { %v2168_v13 = vpop.f32.mrf.mxu0 }
 0x18c   :  { %v2155_v17 = vpop.f32.mrf.mxu1  ;;  %v2196_v19 = vpop.f32.mrf.mxu3 }
 0x18d   :  { %v2156_v20 = vadd.f32 %v2155_v17, %v2143_v28 }
 0x18e   :  { %v2170_v21 = vpop.f32.mrf.mxu0 }
 0x18f   :  { %2432 = vmatmul.bf16.vlgmr.msrb.gmra.mxu1 %v2386_v52  ;;  %v2169_v22 = vadd.f32 %v2168_v13, %v2156_v20  ;;  %v3793_v20 = vld [vmem:[#allocation9 + $0xc] ss:$0 sm:$0xff] }
 0x192   :  { %v2181_v18 = vpop.f32.mrf.mxu2 }
 0x193   :  { %v2182_v23 = vadd.f32 %v2181_v18, %v2169_v22 }
 0x194   :  { %v2157_v26 = vpop.f32.mrf.mxu1 }
 0x195   :  { %v2195_v27 = vadd.f32 %v2194_v12, %v2182_v23 }
 0x197   :  { %v2382_v25 = vmax.f32 %v2195_v27, 0.0 }
 0x199   :  { %v2387_v61 = vpack.c.bf16 %v2382_v25, %v2382_v25 }
 0x19a   :  { %v2183_v31 = vpop.f32.mrf.mxu2 }
 0x19b   :  { %2445 = vmatmul.bf16.vlgmr.msra.gmra.mxu2 %v2387_v61 }
 0x19c   :  { %v2220_v29 = vpop.f32.mrf.mxu3 }
 0x1a4   :  { %v2222_v32 = vpop.f32.mrf.mxu3 }
 0x1a6   :  { %v2233_v33 = vpop.f32.mrf.mxu0 }
 0x1ac   :  { %v2207_v34 = vpop.f32.mrf.mxu1 }
 0x1ad   :  { %v2208_v44 = vadd.f32 %v2207_v34, %v614_v42 }
 0x1ae   :  { %v2235_v35 = vpop.f32.mrf.mxu0 }
 0x1af   :  { %v2221_v39 = vadd.f32 %v2220_v29, %v2208_v44 }
 0x1b1   :  { %v2234_v48 = vadd.f32 %v2233_v33, %v2221_v39 }
 0x1b2   :  { %v2246_v37 = vpop.f32.mrf.mxu2 }
 0x1b3   :  { %v2247_v49 = vadd.f32 %v2246_v37, %v2234_v48 }
 0x1b4   :  { %v2209_v38 = vpop.f32.mrf.mxu1 }
 0x1b6   :  { %v2285_v41 = vpop.f32.mrf.mxu0 }
 0x1ba   :  { %v2248_v43 = vpop.f32.mrf.mxu2 }
 0x1bc   :  { %v2272_v40 = vpop.f32.mrf.mxu3 }
 0x1be   :  { %v2287_v46 = vpop.f32.mrf.mxu0 }
 0x1c4   :  { %v2274_v45 = vpop.f32.mrf.mxu3 }
 0x1cc   :  { %v2259_v55 = vpop.f32.mrf.mxu1 }
 0x1cd   :  { %v2260_v50 = vadd.f32 %v2259_v55, %v2247_v49 }
 0x1ce   :  { %v2311_v51 = vpop.f32.mrf.mxu0 }
 0x1cf   :  { %v2273_v56 = vadd.f32 %v2272_v40, %v2260_v50 }
 0x1d1   :  { %v2286_v57 = vadd.f32 %v2285_v41, %v2273_v56 }
 0x1d2   :  { %v2298_v8 = vpop.f32.mrf.mxu2 }
 0x1d3   :  { %v2383_v63 = vmax.f32 %v2286_v57, 0.0  ;;  %v2299_v5 = vadd.f32 %v2298_v8, %v615_v4 }
 0x1d4   :  { %v2261_v0 = vpop.f32.mrf.mxu1 }
 0x1d5   :  { %v2388_v1 = vpack.c.bf16 %v2383_v63, %v2383_v63  ;;  %v2312_v14 = vadd.f32 %v2311_v51, %v2299_v5 }
 0x1d6   :  { %v2313_v60 = vpop.f32.mrf.mxu0 }
 0x1d7   :  { %2458 = vmatmul.bf16.vlgmr.msrb.gmra.mxu3 %v2388_v1 }
 0x1da   :  { %v2300_v47 = vpop.f32.mrf.mxu2 }
 0x1dc   :  { %v2337_v2 = vpop.f32.mrf.mxu3 }
 0x1e4   :  { %v2339_v3 = vpop.f32.mrf.mxu3 }
 0x1ec   :  { %v2420_v54 = vpop.f32.mrf.mxu3  ;;  %v2324_v15 = vpop.f32.mrf.mxu1 }
 0x1ed   :  { %v2325_v53 = vadd.f32 %v2324_v15, %v2312_v14  ;;  %v2421_v19 = vadd.f32 %v3793_v20, %v2420_v54 }
 0x1ee   :  { %v2363_v24 = vpop.f32.mrf.mxu0 }
 0x1ef   :  { %v2338_v30 = vadd.f32 %v2337_v2, %v2325_v53 }
 0x1f2   :  { %v2350_v9 = vpop.f32.mrf.mxu2 }
 0x1f3   :  { %v2351_v11 = vadd.f32 %v2350_v9, %v2338_v30 }
 0x1f4   :  { %v2422_v6 = vpop.f32.mrf.mxu3  ;;  %v2326_v10 = vpop.f32.mrf.mxu1 }
 0x1f5   :  { %v2364_v52 = vadd.f32 %v2363_v24, %v2351_v11 }
 0x1f6   :  { %v2365_v59 = vpop.f32.mrf.mxu0 }
 0x1fa   :  { %v2352_v12 = vpop.f32.mrf.mxu2 }
 0x1fc   :  { %v2376_v13 = vpop.f32.mrf.mxu1 }
 0x1fd   :  { %v2377_v16 = vadd.f32 %v2376_v13, %v2364_v52 }
 0x1ff   :  { %v2384_v28 = vmax.f32 %v2377_v16, 0.0 }
 0x201   :  { %v2389_v17 = vpack.c.bf16 %v2384_v28, %v2384_v28 }
 0x203   :  { %3526 = vmatmul.msk.bf16.vlgmr.msrb.gmra.mxu0 %vm2405_vm3, %v2389_v17 }
 0x204   :  { %v2378_v7 = vpop.f32.mrf.mxu1 }
 0x20c   :  { %v2433_v21 = vpop.f32.mrf.mxu1 }
 0x20d   :  { %v2434_v22 = vadd.f32 %v2433_v21, %v2421_v19 }
 0x214   :  { %v2435_v18 = vpop.f32.mrf.mxu1 }
 0x21e   :  { %v2446_v23 = vpop.f32.mrf.mxu2 }
 0x21f   :  { %v2447_v26 = vadd.f32 %v2446_v23, %v2434_v22 }
 0x226   :  { %v2448_v27 = vpop.f32.mrf.mxu2 }
 0x25a   :  { %v2459_v25 = vpop.f32.mrf.mxu3 }
 0x25b   :  { %v2460_v61 = vadd.f32 %v2459_v25, %v2447_v26 }
 0x262   :  { %v2461_v29 = vpop.f32.mrf.mxu3 }
 0x280   :  { %v2472_v31 = vpop.f32.mrf.mxu0 }
 0x281   :  { %v2473_v32 = vadd.f32 %v2472_v31, %v2460_v61 }
 0x283   :  { %3794 = vtanh.f32 %v2473_v32 }
 0x288   :  { %v2474_v33 = vpop.f32.mrf.mxu0 }
 0x289   :  { %v3795_v34 = vpop.eup %3794 }
 0x28a   :  { %2478 = vst.msk [vmem:[%s4115_s5] sm:$0xff] %vm2477_vm4, %v3795_v34 }
 0x28b   :  { %2483 = vsyncpa [#allocation3], 1 }
 0x28c   :  { %2484 = vsyncpa [#allocation5], 1 }
 0x28d   :  { %2485 = vsyncpa [#allocation8], 1 }

</bundles_post_ra>
